<compile_context>
chip_gen: v7x
topology: tpu7x:2x2x1
jax: 0.10.0
libtpu: 0.0.40
codegen_flags: <defaults>
</compile_context>

<pallas_src>
import functools

import jax
import jax.numpy as jnp
from jax.experimental import pallas as pl
from jax.experimental.pallas import tpu as pltpu


# ----------------------------- helpers (glue) ------------------------------

def _fold_bn(gamma, beta, mean, var, eps=1e-5):
    s = gamma / jnp.sqrt(var + eps)
    t = beta - mean * s
    return s, t


def _bilinear_matrix(out_size, in_size):
    """Row-stochastic matrix reproducing F.interpolate(bilinear, align_corners=False)."""
    scale = in_size / out_size
    i = jnp.arange(out_size, dtype=jnp.float32)
    src = jnp.maximum(scale * (i + 0.5) - 0.5, 0.0)   # PyTorch clamps src >= 0
    i0 = jnp.floor(src)
    frac = src - i0
    i0 = i0.astype(jnp.int32)
    i1 = jnp.minimum(i0 + 1, in_size - 1)
    m = (jax.nn.one_hot(i0, in_size, dtype=jnp.float32) * (1.0 - frac)[:, None]
         + jax.nn.one_hot(i1, in_size, dtype=jnp.float32) * frac[:, None])
    return m


# ------------------------------- the kernel --------------------------------

def shape_attention_kernel(x1e_ref, x2_ref, x1d_ref, masks_ref, wconv_ref,
                           wattn_ref, wc_ref, bias_ref, mres_ref, out_ref,
                           *, width, c1, bg, hw, lx):
    W, C1 = width, c1
    N0 = x1e_ref.shape[2]            # folded frame-0 length (Bg * Lx)
    N1 = N0 - 2 * (W + 1)            # frame-1 (conv1 output, kept flat-padded)
    N2 = N1 - 2 * (W + 1)            # frame-2 (conv2 output)

    x1e = x1e_ref[0]                 # (C1, N0) bf16, flat zero-padded, batch-folded
    x2 = x2_ref[0]                   # (C2, Bg*S2) bf16
    x1d = x1d_ref[0]                 # (C1, Bg*HW) f32 dense skip copy

    # packed 0/1 masks (conv1 rows 0..2 at length N1, conv2 rows 3..4 at N2)
    mc1 = masks_ref[0:1, :]
    ml1 = masks_ref[1:2, :]
    mr1 = masks_ref[2:3, :]
    ml2 = masks_ref[3:4, :N2]
    mr2 = masks_ref[4:5, :N2]

    # packed biases (BN already folded)
    b1a = bias_ref[0:C1, :]
    b1b = bias_ref[C1:2 * C1, :]
    bc = bias_ref[2 * C1:3 * C1, :]
    ba1 = bias_ref[3 * C1:4 * C1, :]
    ba2 = bias_ref[4 * C1:4 * C1 + 1, :]

    def conv3x3(x_in, row_base, out_len, ml, mr):
        # dy-group split: 3 matmuls of (3*C1, C1) weights, incremental tap
        # accumulation -> live f32 intermediate is 3x smaller than one (9*C1, L)
        # stacked output, and MXU pushes overlap the VPU adds.
        # NOTE: the per-tap lane offsets (dy*W + dx) are small static slices;
        # a pltpu.roll + mask variant is the fallback if the Mosaic dump shows
        # hidden VMEM copies here (review audit item).
        accL = accM = accR = None
        for dy in range(3):
            r0 = row_base + dy * 3 * C1
            y = jnp.dot(wconv_ref[r0:r0 + 3 * C1, :], x_in,
                        preferred_element_type=jnp.float32)   # (3*C1, len(x_in))
            base = dy * W
            l = y[0:C1, base:base + out_len]
            m = y[C1:2 * C1, base + 1:base + 1 + out_len]
            r = y[2 * C1:3 * C1, base + 2:base + 2 + out_len]
            if accL is None:
                accL, accM, accR = l, m, r
            else:
                accL, accM, accR = accL + l, accM + m, accR + r
        return accL * ml + accM + accR * mr

    # ---- residual block, conv1 (mask-multiply == where-select: one VPU pass) ----
    acc1 = conv3x3(x1e, 0, N1, ml1, mr1)
    r1 = jnp.maximum(acc1 + b1a, 0.0) * mc1          # zero the halo -> conv2 reads clean

    # ---- residual block, conv2 ----
    acc2 = conv3x3(r1.astype(jnp.bfloat16), 9 * C1, N2, ml2, mr2)
    r2 = jnp.maximum(acc2 + b1b, 0.0)                # (C1, N2); pad columns are don't-care

    # compact frame-2 real windows to the dense (C1, Bg*HW) layout (128-aligned slices)
    feat1 = jnp.concatenate([r2[:, b * lx:b * lx + hw] for b in range(bg)],
                            axis=1) + x1d

    # ---- branch 2: 1x1 conv first, then the (reassociated, block-diag) resize ----
    t = jnp.dot(wc_ref[...], x2, preferred_element_type=jnp.float32)    # (C1, Bg*S2)
    rz = jnp.dot(t.astype(mres_ref.dtype), mres_ref[...],
                 preferred_element_type=jnp.float32)                    # (C1, Bg*HW)
    feat2 = jnp.maximum(rz + bc, 0.0)

    # ---- attention head: wa1 pre-split into the two channel halves (no concat) ----
    wa1a = wattn_ref[0:C1, :]
    wa1b = wattn_ref[C1:2 * C1, :]
    wa2 = wattn_ref[2 * C1:2 * C1 + 1, :]
    a1 = jnp.maximum(
        jnp.dot(wa1a, feat1.astype(jnp.bfloat16), preferred_element_type=jnp.float32)
        + jnp.dot(wa1b, feat2.astype(jnp.bfloat16), preferred_element_type=jnp.float32)
        + ba1, 0.0)                                                     # (C1, Bg*HW)
    a2 = jnp.maximum(
        jnp.dot(wa2, a1.astype(jnp.bfloat16), preferred_element_type=jnp.float32)
        + ba2, 0.0)                                                     # (1, Bg*HW)
    scale = 1.0 + jax.nn.sigmoid(a2)                                    # feat + feat*attn

    # single full-tile, fully lane-dense store (2*C1 rows == one f32 sublane tile)
    out_ref[0, :, :] = jnp.concatenate([feat1 * scale, feat2 * scale], axis=0)


# ------------------------------ the wrapper ---------------------------------

def shape_attention_forward(input1, input2, params, *, n_groups=None):
    """input1: (B, C1, H, W); input2: (B, C2, H2, W2) -> (B, 2*C1, H, W), NCHW."""
    B, C1, H, W = input1.shape
    _, C2, H2, W2 = input2.shape

    if n_groups is None:
        # v7x has two TensorCores per chip: keep a 2-way parallel grid there;
        # single-TC v5e/v6e fold the whole batch into one wide grid step.
        try:
            kind = jax.devices()[0].device_kind.lower()
        except Exception:
            kind = ""
        n_groups = 2 if ("v7" in kind and B % 2 == 0) else 1
    assert B % n_groups == 0
    Bg = B // n_groups

    HW, S2 = H * W, H2 * W2
    q0 = 2 * (W + 1)                              # real-pixel offset inside each frame
    Lx = -(-(HW + 4 * (W + 1)) // 128) * 128      # per-image frame, lane-tile aligned
    N0 = Bg * Lx
    N1 = N0 - 2 * (W + 1)
    N2 = N1 - 2 * (W + 1)
    HWd = Bg * HW
    (w1a, b1a, w1b, b1b, wc, bc, wa1a, wa1b, ba1, wa2, ba2) = params
    bf = jnp.bfloat16

    def fold(x, length):                          # (B, C, length) -> (ng, C, Bg*length)
        C = x.shape[1]
        return (x.reshape(n_groups, Bg, C, length)
                 .transpose(0, 2, 1, 3)
                 .reshape(n_groups, C, Bg * length))

    x1f = input1.reshape(B, C1, HW)
    x1e = fold(jnp.pad(x1f, ((0, 0), (0, 0), (q0, Lx - q0 - HW))), Lx).astype(bf)
    x1d = fold(x1f, HW)                           # f32 dense skip copy
    x2g = fold(input2.reshape(B, C2, S2), S2).astype(bf)

    # Bilinear-resize operator (input2 grid -> input1 grid), block-diagonal over
    # the folded batch; the 1x1 conv is applied BEFORE the resize in the kernel.
    mh = _bilinear_matrix(H, H2)
    mw = _bilinear_matrix(W, W2)
    mres = jnp.kron(jnp.eye(Bg, dtype=jnp.float32),
                    jnp.kron(mh, mw).T).astype(bf)            # (Bg*S2, Bg*HW)

    # 0/1 masks packed into one slab (built host-side, no in-kernel int div/mod)
    f1 = jnp.arange(N1, dtype=jnp.int32) + (W + 1)
    p1 = f1 % Lx - q0
    real1 = (p1 >= 0) & (p1 < HW)
    col1 = p1 % W
    f2 = jnp.arange(N2, dtype=jnp.int32) + 2 * (W + 1)
    p2 = f2 % Lx - q0
    real2 = (p2 >= 0) & (p2 < HW)
    col2 = p2 % W
    masks = jnp.zeros((8, N1), jnp.float32)
    masks = masks.at[0, :].set(real1.astype(jnp.float32))
    masks = masks.at[1, :].set((real1 & (col1 >= 1)).astype(jnp.float32))
    masks = masks.at[2, :].set((real1 & (col1 <= W - 2)).astype(jnp.float32))
    masks = masks.at[3, :N2].set((real2 & (col2 >= 1)).astype(jnp.float32))
    masks = masks.at[4, :N2].set((real2 & (col2 <= W - 2)).astype(jnp.float32))

    # packed weight / bias slabs -> 4 replicated DMAs instead of ~14 tiny ones
    w_conv = jnp.concatenate([w1a, w1b], axis=0).astype(bf)          # (18*C1, C1)
    w_attn = jnp.concatenate([wa1a, wa1b, wa2], axis=0).astype(bf)   # (2*C1+1, C1)
    bias = jnp.concatenate([b1a, b1b, bc, ba1, ba2], axis=0)         # (4*C1+1, 1) f32

    operands = (x1e, x2g, x1d, masks, w_conv, w_attn, wc.astype(bf), bias, mres)

    def rep(a):
        shape = a.shape
        return pl.BlockSpec(shape, lambda g: (0,) * len(shape))

    in_specs = [pl.BlockSpec((1, C1, N0), lambda g: (g, 0, 0)),
                pl.BlockSpec((1, C2, Bg * S2), lambda g: (g, 0, 0)),
                pl.BlockSpec((1, C1, HWd), lambda g: (g, 0, 0))]
    in_specs += [rep(a) for a in operands[3:]]

    grid_spec = pltpu.PrefetchScalarGridSpec(
        num_scalar_prefetch=0,
        grid=(n_groups,),
        in_specs=in_specs,
        out_specs=pl.BlockSpec((1, 2 * C1, HWd), lambda g: (g, 0, 0)),
    )

    out = pl.pallas_call(
        functools.partial(shape_attention_kernel,
                          width=W, c1=C1, bg=Bg, hw=HW, lx=Lx),
        out_shape=jax.ShapeDtypeStruct((n_groups, 2 * C1, HWd), jnp.float32),
        grid_spec=grid_spec,
        compiler_params=pltpu.CompilerParams(dimension_semantics=("parallel",)),
    )(*operands)

    return (out.reshape(n_groups, 2 * C1, Bg, HW)
               .transpose(0, 2, 1, 3)
               .reshape(B, 2 * C1, H, W))                            # already NCHW


# -------------------------- deterministic params -----------------------------

def init_params(key, C1, C2):
    ks = iter(jax.random.split(key, 32))

    def conv_bn(cin, cout, taps=1):
        w = 0.2 * jax.random.normal(next(ks), (taps, cin, cout), jnp.float32)
        b = 0.1 * jax.random.normal(next(ks), (cout,), jnp.float32)
        gamma = jax.random.uniform(next(ks), (cout,), jnp.float32, minval=0.5, maxval=1.5)
        beta = 0.1 * jax.random.normal(next(ks), (cout,), jnp.float32)
        mean = 0.1 * jax.random.normal(next(ks), (cout,), jnp.float32)
        var = jax.random.uniform(next(ks), (cout,), jnp.float32, minval=0.5, maxval=1.5)
        s, t = _fold_bn(gamma, beta, mean, var)
        w = w * s                                   # fold BN scale (out channel = last axis)
        bias = (b * s + t).reshape(cout, 1)         # fold BN shift
        # kernel layout: rows = taps-major / out-channel-minor, cols = in channels
        w_all = jnp.transpose(w, (0, 2, 1)).reshape(taps * cout, cin)
        return w_all, bias

    w1a, b1a = conv_bn(C1, C1, taps=9)      # res-block conv1 (3x3)
    w1b, b1b = conv_bn(C1, C1, taps=9)      # res-block conv2 (3x3)
    wc, bc = conv_bn(C2, C1)                # conv1x1 on (resized) input2
    wa1, ba1 = conv_bn(2 * C1, C1)          # attention conv 2C1 -> C1
    wa2, ba2 = conv_bn(C1, 1)               # attention conv C1 -> 1
    wa1a, wa1b = wa1[:, :C1], wa1[:, C1:]   # split into feat1 / feat2 input halves
    return (w1a, b1a, w1b, b1b, wc, bc, wa1a, wa1b, ba1, wa2, ba2)


# ------------------------------ pure-JAX reference ---------------------------

def reference_forward(input1, input2, params):
    B, C1, H, W = input1.shape
    _, C2, H2, W2 = input2.shape
    (w1a, b1a, w1b, b1b, wc, bc, wa1a, wa1b, ba1, wa2, ba2) = params
    x1 = jnp.transpose(input1, (0, 2, 3, 1))     # NHWC
    x2 = jnp.transpose(input2, (0, 2, 3, 1))

    def conv3x3(x, w_all, b):                    # w_all: (9*Cout, Cin), b: (Cout, 1)
        cout = b.shape[0]
        cin = x.shape[-1]
        w = w_all.reshape(9, cout, cin)
        xp = jnp.pad(x, ((0, 0), (1, 1), (1, 1), (0, 0)))
        acc = jnp.zeros(x.shape[:3] + (cout,), jnp.float32)
        for k in range(9):
            dy, dx = k // 3, k % 3
            acc = acc + jnp.einsum('bhwc,dc->bhwd', xp[:, dy:dy + H, dx:dx + W, :], w[k])
        return acc + b[:, 0].reshape(1, 1, 1, -1)

    r1 = jnp.maximum(conv3x3(x1, w1a, b1a), 0.0)
    r2 = jnp.maximum(conv3x3(r1, w1b, b1b), 0.0)
    feat1 = r2 + x1

    mh = _bilinear_matrix(H, H2)
    mw = _bilinear_matrix(W, W2)
    rz = jnp.einsum('hH,wW,bHWc->bhwc', mh, mw, x2)
    feat2 = jnp.maximum(jnp.einsum('bhwc,dc->bhwd', rz, wc)
                        + bc[:, 0].reshape(1, 1, 1, -1), 0.0)

    a1 = jnp.maximum(jnp.einsum('bhwc,dc->bhwd', feat1, wa1a)
                     + jnp.einsum('bhwc,dc->bhwd', feat2, wa1b)
                     + ba1[:, 0].reshape(1, 1, 1, -1), 0.0)
    a2 = jnp.maximum(jnp.einsum('bhwc,dc->bhwd', a1, wa2)
                     + ba2[:, 0].reshape(1, 1, 1, -1), 0.0)
    attn = jax.nn.sigmoid(a2)
    feat = jnp.concatenate([feat1, feat2], axis=-1)
    out = feat * (1.0 + attn)
    return jnp.transpose(out, (0, 3, 1, 2))


# ----------------------------------- main ------------------------------------

if __name__ == "__main__":
    key = jax.random.PRNGKey(0)
    k1, k2, kp = jax.random.split(key, 3)

    B, C1, H, W = 2, 4, 16, 16      # input1: high-res feature map
    C2, H2, W2 = 8, 8, 8            # input2: lower-res feature map (gets upsampled)
    # note: input1_os / input2_os only define self.os, which is unused in forward.

    input1 = jax.random.normal(k1, (B, C1, H, W), jnp.float32)
    input2 = jax.random.normal(k2, (B, C2, H2, W2), jnp.float32)
    params = init_params(kp, C1, C2)

    out = shape_attention_forward(input1, input2, params)
    out = jax.block_until_ready(out)

    ref = reference_forward(input1, input2, params)
    assert out.shape == (B, 2 * C1, H, W)
    assert bool(jnp.all(jnp.isfinite(out)))
    # tolerance accounts for bf16 MXU operands (accumulation stays f32)
    max_err = float(jnp.max(jnp.abs(out - ref)))
    assert bool(jnp.allclose(out, ref, atol=5e-2, rtol=5e-2)), max_err

    print("KERNEL_OK")
</pallas_src>

<mosaic_0001>
module attributes {stable_mosaic.version = 11 : i64} {
  func.func @shape_attention_kernel(%arg0: i32, %arg1: memref<1x4x768xbf16, #tpu.memory_space<vmem>>, %arg2: memref<1x8x128xbf16, #tpu.memory_space<vmem>>, %arg3: memref<1x4x512xf32, #tpu.memory_space<vmem>>, %arg4: memref<8x734xf32, #tpu.memory_space<vmem>>, %arg5: memref<72x4xbf16, #tpu.memory_space<vmem>>, %arg6: memref<9x4xbf16, #tpu.memory_space<vmem>>, %arg7: memref<4x8xbf16, #tpu.memory_space<vmem>>, %arg8: memref<17x1xf32, #tpu.memory_space<vmem>>, %arg9: memref<128x512xbf16, #tpu.memory_space<vmem>>, %arg10: memref<1x8x512xf32, #tpu.memory_space<vmem>>) attributes {dimension_semantics = [#tpu.dimension_semantics<parallel>], iteration_bounds = array<i64: 1>, scalar_prefetch = 0 : i64, scratch_operands = 0 : i64, tpu.core_type = #tpu.core_type<tc>, window_params = [{transform_indices = @transform_0, window_bounds = array<i64: 1, 4, 768>}, {transform_indices = @transform_1, window_bounds = array<i64: 1, 8, 128>}, {transform_indices = @transform_2, window_bounds = array<i64: 1, 4, 512>}, {pipeline_mode = #tpu.pipeline_mode<synchronous>, transform_indices = @transform_3, window_bounds = array<i64: 8, 734>}, {pipeline_mode = #tpu.pipeline_mode<synchronous>, transform_indices = @transform_4, window_bounds = array<i64: 72, 4>}, {pipeline_mode = #tpu.pipeline_mode<synchronous>, transform_indices = @transform_5, window_bounds = array<i64: 9, 4>}, {pipeline_mode = #tpu.pipeline_mode<synchronous>, transform_indices = @transform_6, window_bounds = array<i64: 4, 8>}, {pipeline_mode = #tpu.pipeline_mode<synchronous>, transform_indices = @transform_7, window_bounds = array<i64: 17, 1>}, {pipeline_mode = #tpu.pipeline_mode<synchronous>, transform_indices = @transform_8, window_bounds = array<i64: 128, 512>}, {transform_indices = @transform_9, window_bounds = array<i64: 1, 8, 512>}]} {
    %c0 = arith.constant 0 : index
    %c0_0 = arith.constant 0 : index
    %c0_1 = arith.constant 0 : index
    %0 = vector.load %arg1[%c0, %c0_0, %c0_1] : memref<1x4x768xbf16, #tpu.memory_space<vmem>>, vector<1x4x768xbf16>
    %1 = vector.shape_cast %0 : vector<1x4x768xbf16> to vector<4x768xbf16>
    %c0_2 = arith.constant 0 : index
    %c0_3 = arith.constant 0 : index
    %c0_4 = arith.constant 0 : index
    %2 = vector.load %arg2[%c0_2, %c0_3, %c0_4] : memref<1x8x128xbf16, #tpu.memory_space<vmem>>, vector<1x8x128xbf16>
    %3 = vector.shape_cast %2 : vector<1x8x128xbf16> to vector<8x128xbf16>
    %c0_5 = arith.constant 0 : index
    %c0_6 = arith.constant 0 : index
    %c0_7 = arith.constant 0 : index
    %4 = vector.load %arg3[%c0_5, %c0_6, %c0_7] : memref<1x4x512xf32, #tpu.memory_space<vmem>>, vector<1x4x512xf32>
    %5 = vector.shape_cast %4 : vector<1x4x512xf32> to vector<4x512xf32>
    %c0_8 = arith.constant 0 : index
    %c0_9 = arith.constant 0 : index
    %6 = vector.load %arg4[%c0_8, %c0_9] : memref<8x734xf32, #tpu.memory_space<vmem>>, vector<1x734xf32>
    %c1 = arith.constant 1 : index
    %c0_10 = arith.constant 0 : index
    %7 = vector.load %arg4[%c1, %c0_10] : memref<8x734xf32, #tpu.memory_space<vmem>>, vector<1x734xf32>
    %c2 = arith.constant 2 : index
    %c0_11 = arith.constant 0 : index
    %8 = vector.load %arg4[%c2, %c0_11] : memref<8x734xf32, #tpu.memory_space<vmem>>, vector<1x734xf32>
    %c3 = arith.constant 3 : index
    %c0_12 = arith.constant 0 : index
    %9 = vector.load %arg4[%c3, %c0_12] : memref<8x734xf32, #tpu.memory_space<vmem>>, vector<1x700xf32>
    %c4 = arith.constant 4 : index
    %c0_13 = arith.constant 0 : index
    %10 = vector.load %arg4[%c4, %c0_13] : memref<8x734xf32, #tpu.memory_space<vmem>>, vector<1x700xf32>
    %c0_14 = arith.constant 0 : index
    %c0_15 = arith.constant 0 : index
    %11 = vector.load %arg8[%c0_14, %c0_15] : memref<17x1xf32, #tpu.memory_space<vmem>>, vector<4x1xf32>
    %c4_16 = arith.constant 4 : index
    %c0_17 = arith.constant 0 : index
    %12 = vector.load %arg8[%c4_16, %c0_17] : memref<17x1xf32, #tpu.memory_space<vmem>>, vector<4x1xf32>
    %c8 = arith.constant 8 : index
    %c0_18 = arith.constant 0 : index
    %13 = vector.load %arg8[%c8, %c0_18] : memref<17x1xf32, #tpu.memory_space<vmem>>, vector<4x1xf32>
    %c12 = arith.constant 12 : index
    %c0_19 = arith.constant 0 : index
    %14 = vector.load %arg8[%c12, %c0_19] : memref<17x1xf32, #tpu.memory_space<vmem>>, vector<4x1xf32>
    %c16 = arith.constant 16 : index
    %c0_20 = arith.constant 0 : index
    %15 = vector.load %arg8[%c16, %c0_20] : memref<17x1xf32, #tpu.memory_space<vmem>>, vector<1x1xf32>
    %c0_21 = arith.constant 0 : index
    %c0_22 = arith.constant 0 : index
    %16 = vector.load %arg5[%c0_21, %c0_22] : memref<72x4xbf16, #tpu.memory_space<vmem>>, vector<12x4xbf16>
    %cst = arith.constant dense<0.000000e+00> : vector<12x768xf32>
    %17 = tpu.matmul %16, %1, %cst {dimension_numbers = #tpu.dot_dimension_numbers<[1], [0], [0], [1], [0, 0, 1, 1], [], []>} : vector<12x4xbf16>, vector<4x768xbf16>, vector<12x768xf32> -> vector<12x768xf32>
    %18 = vector.extract_strided_slice %17 {offsets = [0, 0], sizes = [4, 734], strides = [1, 1]} : vector<12x768xf32> to vector<4x734xf32>
    %19 = vector.extract_strided_slice %17 {offsets = [4, 1], sizes = [4, 734], strides = [1, 1]} : vector<12x768xf32> to vector<4x734xf32>
    %20 = vector.extract_strided_slice %17 {offsets = [8, 2], sizes = [4, 734], strides = [1, 1]} : vector<12x768xf32> to vector<4x734xf32>
    %c12_23 = arith.constant 12 : index
    %c0_24 = arith.constant 0 : index
    %21 = vector.load %arg5[%c12_23, %c0_24] : memref<72x4xbf16, #tpu.memory_space<vmem>>, vector<12x4xbf16>
    %cst_25 = arith.constant dense<0.000000e+00> : vector<12x768xf32>
    %22 = tpu.matmul %21, %1, %cst_25 {dimension_numbers = #tpu.dot_dimension_numbers<[1], [0], [0], [1], [0, 0, 1, 1], [], []>} : vector<12x4xbf16>, vector<4x768xbf16>, vector<12x768xf32> -> vector<12x768xf32>
    %23 = vector.extract_strided_slice %22 {offsets = [0, 16], sizes = [4, 734], strides = [1, 1]} : vector<12x768xf32> to vector<4x734xf32>
    %24 = vector.extract_strided_slice %22 {offsets = [4, 17], sizes = [4, 734], strides = [1, 1]} : vector<12x768xf32> to vector<4x734xf32>
    %25 = vector.extract_strided_slice %22 {offsets = [8, 18], sizes = [4, 734], strides = [1, 1]} : vector<12x768xf32> to vector<4x734xf32>
    %26 = arith.addf %18, %23 : vector<4x734xf32>
    %27 = arith.addf %19, %24 : vector<4x734xf32>
    %28 = arith.addf %20, %25 : vector<4x734xf32>
    %c24 = arith.constant 24 : index
    %c0_26 = arith.constant 0 : index
    %29 = vector.load %arg5[%c24, %c0_26] : memref<72x4xbf16, #tpu.memory_space<vmem>>, vector<12x4xbf16>
    %cst_27 = arith.constant dense<0.000000e+00> : vector<12x768xf32>
    %30 = tpu.matmul %29, %1, %cst_27 {dimension_numbers = #tpu.dot_dimension_numbers<[1], [0], [0], [1], [0, 0, 1, 1], [], []>} : vector<12x4xbf16>, vector<4x768xbf16>, vector<12x768xf32> -> vector<12x768xf32>
    %31 = vector.extract_strided_slice %30 {offsets = [0, 32], sizes = [4, 734], strides = [1, 1]} : vector<12x768xf32> to vector<4x734xf32>
    %32 = vector.extract_strided_slice %30 {offsets = [4, 33], sizes = [4, 734], strides = [1, 1]} : vector<12x768xf32> to vector<4x734xf32>
    %33 = vector.extract_strided_slice %30 {offsets = [8, 34], sizes = [4, 734], strides = [1, 1]} : vector<12x768xf32> to vector<4x734xf32>
    %34 = arith.addf %26, %31 : vector<4x734xf32>
    %35 = arith.addf %27, %32 : vector<4x734xf32>
    %36 = arith.addf %28, %33 : vector<4x734xf32>
    %37 = vector.broadcast %7 : vector<1x734xf32> to vector<4x734xf32>
    %38 = arith.mulf %34, %37 : vector<4x734xf32>
    %39 = arith.addf %38, %35 : vector<4x734xf32>
    %40 = vector.broadcast %8 : vector<1x734xf32> to vector<4x734xf32>
    %41 = arith.mulf %36, %40 : vector<4x734xf32>
    %42 = arith.addf %39, %41 : vector<4x734xf32>
    %43 = vector.broadcast %11 : vector<4x1xf32> to vector<4x734xf32>
    %44 = arith.addf %42, %43 : vector<4x734xf32>
    %cst_28 = arith.constant 0.000000e+00 : f32
    %45 = vector.broadcast %cst_28 : f32 to vector<4x734xf32>
    %46 = arith.maximumf %44, %45 : vector<4x734xf32>
    %47 = vector.broadcast %6 : vector<1x734xf32> to vector<4x734xf32>
    %48 = arith.mulf %46, %47 : vector<4x734xf32>
    %49 = arith.truncf %48 : vector<4x734xf32> to vector<4x734xbf16>
    %c36 = arith.constant 36 : index
    %c0_29 = arith.constant 0 : index
    %50 = vector.load %arg5[%c36, %c0_29] : memref<72x4xbf16, #tpu.memory_space<vmem>>, vector<12x4xbf16>
    %cst_30 = arith.constant dense<0.000000e+00> : vector<12x734xf32>
    %51 = tpu.matmul %50, %49, %cst_30 {dimension_numbers = #tpu.dot_dimension_numbers<[1], [0], [0], [1], [0, 0, 1, 1], [], []>} : vector<12x4xbf16>, vector<4x734xbf16>, vector<12x734xf32> -> vector<12x734xf32>
    %52 = vector.extract_strided_slice %51 {offsets = [0, 0], sizes = [4, 700], strides = [1, 1]} : vector<12x734xf32> to vector<4x700xf32>
    %53 = vector.extract_strided_slice %51 {offsets = [4, 1], sizes = [4, 700], strides = [1, 1]} : vector<12x734xf32> to vector<4x700xf32>
    %54 = vector.extract_strided_slice %51 {offsets = [8, 2], sizes = [4, 700], strides = [1, 1]} : vector<12x734xf32> to vector<4x700xf32>
    %c48 = arith.constant 48 : index
    %c0_31 = arith.constant 0 : index
    %55 = vector.load %arg5[%c48, %c0_31] : memref<72x4xbf16, #tpu.memory_space<vmem>>, vector<12x4xbf16>
    %cst_32 = arith.constant dense<0.000000e+00> : vector<12x734xf32>
    %56 = tpu.matmul %55, %49, %cst_32 {dimension_numbers = #tpu.dot_dimension_numbers<[1], [0], [0], [1], [0, 0, 1, 1], [], []>} : vector<12x4xbf16>, vector<4x734xbf16>, vector<12x734xf32> -> vector<12x734xf32>
    %57 = vector.extract_strided_slice %56 {offsets = [0, 16], sizes = [4, 700], strides = [1, 1]} : vector<12x734xf32> to vector<4x700xf32>
    %58 = vector.extract_strided_slice %56 {offsets = [4, 17], sizes = [4, 700], strides = [1, 1]} : vector<12x734xf32> to vector<4x700xf32>
    %59 = vector.extract_strided_slice %56 {offsets = [8, 18], sizes = [4, 700], strides = [1, 1]} : vector<12x734xf32> to vector<4x700xf32>
    %60 = arith.addf %52, %57 : vector<4x700xf32>
    %61 = arith.addf %53, %58 : vector<4x700xf32>
    %62 = arith.addf %54, %59 : vector<4x700xf32>
    %c60 = arith.constant 60 : index
    %c0_33 = arith.constant 0 : index
    %63 = vector.load %arg5[%c60, %c0_33] : memref<72x4xbf16, #tpu.memory_space<vmem>>, vector<12x4xbf16>
    %cst_34 = arith.constant dense<0.000000e+00> : vector<12x734xf32>
    %64 = tpu.matmul %63, %49, %cst_34 {dimension_numbers = #tpu.dot_dimension_numbers<[1], [0], [0], [1], [0, 0, 1, 1], [], []>} : vector<12x4xbf16>, vector<4x734xbf16>, vector<12x734xf32> -> vector<12x734xf32>
    %65 = vector.extract_strided_slice %64 {offsets = [0, 32], sizes = [4, 700], strides = [1, 1]} : vector<12x734xf32> to vector<4x700xf32>
    %66 = vector.extract_strided_slice %64 {offsets = [4, 33], sizes = [4, 700], strides = [1, 1]} : vector<12x734xf32> to vector<4x700xf32>
    %67 = vector.extract_strided_slice %64 {offsets = [8, 34], sizes = [4, 700], strides = [1, 1]} : vector<12x734xf32> to vector<4x700xf32>
    %68 = arith.addf %60, %65 : vector<4x700xf32>
    %69 = arith.addf %61, %66 : vector<4x700xf32>
    %70 = arith.addf %62, %67 : vector<4x700xf32>
    %71 = vector.broadcast %9 : vector<1x700xf32> to vector<4x700xf32>
    %72 = arith.mulf %68, %71 : vector<4x700xf32>
    %73 = arith.addf %72, %69 : vector<4x700xf32>
    %74 = vector.broadcast %10 : vector<1x700xf32> to vector<4x700xf32>
    %75 = arith.mulf %70, %74 : vector<4x700xf32>
    %76 = arith.addf %73, %75 : vector<4x700xf32>
    %77 = vector.broadcast %12 : vector<4x1xf32> to vector<4x700xf32>
    %78 = arith.addf %76, %77 : vector<4x700xf32>
    %cst_35 = arith.constant 0.000000e+00 : f32
    %79 = vector.broadcast %cst_35 : f32 to vector<4x700xf32>
    %80 = arith.maximumf %78, %79 : vector<4x700xf32>
    %81 = vector.extract_strided_slice %80 {offsets = [0, 0], sizes = [4, 256], strides = [1, 1]} : vector<4x700xf32> to vector<4x256xf32>
    %82 = vector.extract_strided_slice %80 {offsets = [0, 384], sizes = [4, 256], strides = [1, 1]} : vector<4x700xf32> to vector<4x256xf32>
    %83 = tpu.concatenate %81, %82 in 1 : vector<4x256xf32>, vector<4x256xf32> -> vector<4x512xf32>
    %84 = arith.addf %83, %5 : vector<4x512xf32>
    %c0_36 = arith.constant 0 : index
    %c0_37 = arith.constant 0 : index
    %85 = vector.load %arg7[%c0_36, %c0_37] : memref<4x8xbf16, #tpu.memory_space<vmem>>, vector<4x8xbf16>
    %cst_38 = arith.constant dense<0.000000e+00> : vector<4x128xf32>
    %86 = tpu.matmul %85, %3, %cst_38 {dimension_numbers = #tpu.dot_dimension_numbers<[1], [0], [0], [1], [0, 0, 1, 1], [], []>} : vector<4x8xbf16>, vector<8x128xbf16>, vector<4x128xf32> -> vector<4x128xf32>
    %87 = arith.truncf %86 : vector<4x128xf32> to vector<4x128xbf16>
    %c0_39 = arith.constant 0 : index
    %c0_40 = arith.constant 0 : index
    %88 = vector.load %arg9[%c0_39, %c0_40] : memref<128x512xbf16, #tpu.memory_space<vmem>>, vector<128x512xbf16>
    %cst_41 = arith.constant dense<0.000000e+00> : vector<4x512xf32>
    %89 = tpu.matmul %87, %88, %cst_41 {dimension_numbers = #tpu.dot_dimension_numbers<[1], [0], [0], [1], [0, 0, 1, 1], [], []>} : vector<4x128xbf16>, vector<128x512xbf16>, vector<4x512xf32> -> vector<4x512xf32>
    %90 = vector.broadcast %13 : vector<4x1xf32> to vector<4x512xf32>
    %91 = arith.addf %89, %90 : vector<4x512xf32>
    %cst_42 = arith.constant 0.000000e+00 : f32
    %92 = vector.broadcast %cst_42 : f32 to vector<4x512xf32>
    %93 = arith.maximumf %91, %92 : vector<4x512xf32>
    %c0_43 = arith.constant 0 : index
    %c0_44 = arith.constant 0 : index
    %94 = vector.load %arg6[%c0_43, %c0_44] : memref<9x4xbf16, #tpu.memory_space<vmem>>, vector<4x4xbf16>
    %c4_45 = arith.constant 4 : index
    %c0_46 = arith.constant 0 : index
    %95 = vector.load %arg6[%c4_45, %c0_46] : memref<9x4xbf16, #tpu.memory_space<vmem>>, vector<4x4xbf16>
    %c8_47 = arith.constant 8 : index
    %c0_48 = arith.constant 0 : index
    %96 = vector.load %arg6[%c8_47, %c0_48] : memref<9x4xbf16, #tpu.memory_space<vmem>>, vector<1x4xbf16>
    %97 = arith.truncf %84 : vector<4x512xf32> to vector<4x512xbf16>
    %cst_49 = arith.constant dense<0.000000e+00> : vector<4x512xf32>
    %98 = tpu.matmul %94, %97, %cst_49 {dimension_numbers = #tpu.dot_dimension_numbers<[1], [0], [0], [1], [0, 0, 1, 1], [], []>} : vector<4x4xbf16>, vector<4x512xbf16>, vector<4x512xf32> -> vector<4x512xf32>
    %99 = arith.truncf %93 : vector<4x512xf32> to vector<4x512xbf16>
    %cst_50 = arith.constant dense<0.000000e+00> : vector<4x512xf32>
    %100 = tpu.matmul %95, %99, %cst_50 {dimension_numbers = #tpu.dot_dimension_numbers<[1], [0], [0], [1], [0, 0, 1, 1], [], []>} : vector<4x4xbf16>, vector<4x512xbf16>, vector<4x512xf32> -> vector<4x512xf32>
    %101 = arith.addf %98, %100 : vector<4x512xf32>
    %102 = vector.broadcast %14 : vector<4x1xf32> to vector<4x512xf32>
    %103 = arith.addf %101, %102 : vector<4x512xf32>
    %cst_51 = arith.constant 0.000000e+00 : f32
    %104 = vector.broadcast %cst_51 : f32 to vector<4x512xf32>
    %105 = arith.maximumf %103, %104 : vector<4x512xf32>
    %106 = arith.truncf %105 : vector<4x512xf32> to vector<4x512xbf16>
    %cst_52 = arith.constant dense<0.000000e+00> : vector<1x512xf32>
    %107 = tpu.matmul %96, %106, %cst_52 {dimension_numbers = #tpu.dot_dimension_numbers<[1], [0], [0], [1], [0, 0, 1, 1], [], []>} : vector<1x4xbf16>, vector<4x512xbf16>, vector<1x512xf32> -> vector<1x512xf32>
    %108 = vector.broadcast %15 : vector<1x1xf32> to vector<1x512xf32>
    %109 = arith.addf %107, %108 : vector<1x512xf32>
    %cst_53 = arith.constant 0.000000e+00 : f32
    %110 = vector.broadcast %cst_53 : f32 to vector<1x512xf32>
    %111 = arith.maximumf %109, %110 : vector<1x512xf32>
    %112 = arith.negf %111 : vector<1x512xf32>
    %113 = math.exp %112 : vector<1x512xf32>
    %cst_54 = arith.constant 1.000000e+00 : f32
    %114 = vector.broadcast %cst_54 : f32 to vector<1x512xf32>
    %115 = arith.addf %114, %113 : vector<1x512xf32>
    %116 = arith.divf %114, %115 : vector<1x512xf32>
    %cst_55 = arith.constant 1.000000e+00 : f32
    %117 = vector.broadcast %cst_55 : f32 to vector<1x512xf32>
    %118 = arith.addf %117, %116 : vector<1x512xf32>
    %119 = vector.broadcast %118 : vector<1x512xf32> to vector<4x512xf32>
    %120 = arith.mulf %84, %119 : vector<4x512xf32>
    %121 = vector.broadcast %118 : vector<1x512xf32> to vector<4x512xf32>
    %122 = arith.mulf %93, %121 : vector<4x512xf32>
    %123 = tpu.concatenate %120, %122 in 0 : vector<4x512xf32>, vector<4x512xf32> -> vector<8x512xf32>
    %c0_56 = arith.constant 0 : index
    %c0_57 = arith.constant 0 : index
    %c0_58 = arith.constant 0 : index
    %124 = vector.load %arg10[%c0_56, %c0_57, %c0_58] : memref<1x8x512xf32, #tpu.memory_space<vmem>>, vector<1x8x512xf32>
    %125 = vector.shape_cast %124 : vector<1x8x512xf32> to vector<8x512xf32>
    %126 = vector.shape_cast %123 : vector<8x512xf32> to vector<1x8x512xf32>
    tpu.vector_store %arg10[%c0_56, %c0_57, %c0_58], %126 {strides = array<i32>} : memref<1x8x512xf32, #tpu.memory_space<vmem>>, vector<1x8x512xf32>,
    return
  }
  func.func @transform_0(%arg0: i32) -> (i32, i32, i32) {
    %c0_i32 = arith.constant 0 : i32
    %c0_i32_0 = arith.constant 0 : i32
    %c0_i32_1 = arith.constant 0 : i32
    return %arg0, %c0_i32, %c0_i32_0 : i32, i32, i32
  }
  func.func @transform_1(%arg0: i32) -> (i32, i32, i32) {
    %c0_i32 = arith.constant 0 : i32
    %c0_i32_0 = arith.constant 0 : i32
    %c0_i32_1 = arith.constant 0 : i32
    return %arg0, %c0_i32, %c0_i32_0 : i32, i32, i32
  }
  func.func @transform_2(%arg0: i32) -> (i32, i32, i32) {
    %c0_i32 = arith.constant 0 : i32
    %c0_i32_0 = arith.constant 0 : i32
    %c0_i32_1 = arith.constant 0 : i32
    return %arg0, %c0_i32, %c0_i32_0 : i32, i32, i32
  }
  func.func @transform_3(%arg0: i32) -> (i32, i32) {
    %c0_i32 = arith.constant 0 : i32
    %c0_i32_0 = arith.constant 0 : i32
    %c0_i32_1 = arith.constant 0 : i32
    return %c0_i32, %c0_i32_0 : i32, i32
  }
  func.func @transform_4(%arg0: i32) -> (i32, i32) {
    %c0_i32 = arith.constant 0 : i32
    %c0_i32_0 = arith.constant 0 : i32
    %c0_i32_1 = arith.constant 0 : i32
    return %c0_i32, %c0_i32_0 : i32, i32
  }
  func.func @transform_5(%arg0: i32) -> (i32, i32) {
    %c0_i32 = arith.constant 0 : i32
    %c0_i32_0 = arith.constant 0 : i32
    %c0_i32_1 = arith.constant 0 : i32
    return %c0_i32, %c0_i32_0 : i32, i32
  }
  func.func @transform_6(%arg0: i32) -> (i32, i32) {
    %c0_i32 = arith.constant 0 : i32
    %c0_i32_0 = arith.constant 0 : i32
    %c0_i32_1 = arith.constant 0 : i32
    return %c0_i32, %c0_i32_0 : i32, i32
  }
  func.func @transform_7(%arg0: i32) -> (i32, i32) {
    %c0_i32 = arith.constant 0 : i32
    %c0_i32_0 = arith.constant 0 : i32
    %c0_i32_1 = arith.constant 0 : i32
    return %c0_i32, %c0_i32_0 : i32, i32
  }
  func.func @transform_8(%arg0: i32) -> (i32, i32) {
    %c0_i32 = arith.constant 0 : i32
    %c0_i32_0 = arith.constant 0 : i32
    %c0_i32_1 = arith.constant 0 : i32
    return %c0_i32, %c0_i32_0 : i32, i32
  }
  func.func @transform_9(%arg0: i32) -> (i32, i32, i32) {
    %c0_i32 = arith.constant 0 : i32
    %c0_i32_0 = arith.constant 0 : i32
    %c0_i32_1 = arith.constant 0 : i32
    return %arg0, %c0_i32, %c0_i32_0 : i32, i32, i32
  }
}

</mosaic_0001>

<bundles_post_ra>
// kernel: tpu_custom_call.1
= control target key start
LH: loop header
LB: loop body
LE: loop exit
PB: predicated region body
PF: predicated region fallthrough
CT: control target
= control target key end

     0   :  { %14 = vsyncpa [#allocation3], 0  ;;  %s3367_s0 = inlined_call_operand.vmem [shape: bf16[1,4,768], index: 0, kind: input, shape index: {}]   ;;  %s3368_s1 = inlined_call_operand.vmem [shape: bf16[1,8,128], index: 1, kind: input, shape index: {}]   ;;  %s3369_s2 = inlined_call_operand.vmem [shape: f32[1,4,512], index: 2, kind: input, shape index: {}]   ;;  %s3370_s3 = inlined_call_operand.vmem [shape: f32[8,734], index: 3, kind: input, shape index: {}]   ;;  %s3371_s4 = inlined_call_operand.vmem [shape: bf16[72,4], index: 4, kind: input, shape index: {}]   ;;  %s3372_s5 = inlined_call_operand.vmem [shape: bf16[9,4], index: 5, kind: input, shape index: {}]   ;;  %s3373_s6 = inlined_call_operand.vmem [shape: bf16[4,8], index: 6, kind: input, shape index: {}]   ;;  %s3374_s7 = inlined_call_operand.vmem [shape: f32[17,1], index: 7, kind: input, shape index: {}]   ;;  %s3375_s8 = inlined_call_operand.hbm [shape: bf16[128,512], index: 8, kind: input, shape index: {}]   ;;  %s3376_s9 = inlined_call_operand.hbm [shape: f32[1,8,512], index: 9, kind: output, shape index: {}]  }
   0x1   :  { %15 = vsyncpa [#allocation4], 0  ;;  %s2657_s30 = smov [#allocation2]   ;;  %s2609_s13 = scalar_lea.hbm %s3375_s8, 4096 }
   0x2   :  { %s37_s10 = sshll.u32 %s2657_s30, 4  ;;  %p2610_p0 = scmp.ne.s32.totalorder %s3375_s8, %s2609_s13  ;;  %s38_s10 = int_to_ptr.vmem [resolvable:$true] %s37_s10 }
   0x3   :  { %p2613_p1 = scmp.lt.u32.totalorder %s2609_s13, %s3375_s8 }
   0x5   :  { %p2615_p2 = pnand %p2613_p1, %p2610_p0 }
   0x7   :  { %2618 = shalt.err (!%p2615_p2)
}
   0x8   :  { %s2619_s18 = scalar_lea.vmem %s38_s10, 4096  ;;  %p2624_p4 = scmp.lt.s32.totalorder %s38_s10, %s38_s10 }
   0x9   :  { %p2620_p3 = scmp.ne.s32.totalorder %s38_s10, %s2619_s18  ;;  %p2625_p5 = scmp.lt.s32.totalorder %s2619_s18, %s2619_s18 }
   0xb   :  { %p2626_p6 = por %p2625_p5, %p2624_p4 }
   0xd   :  { %p2627_p7 = pnand %p2626_p6, %p2620_p3 }
   0xf   :  { %2630 = shalt.err (!%p2627_p7)
}
  0x10   :  { %s2658_s19 = smov 256   ;;  %s2659_s20 = smov 16  }
  0x11   :  { %43 = dma.hbm_to_vmem [thread:$0]  %s3375_s8, 4096, %s38_s10, [#allocation3], %s2658_s19, %s2658_s19, %s2659_s20  }
  0x12   :  { %2653 = dma.done.wait [#allocation3], 4096  }
  0x13   :  { %2654 = vsyncadd [#allocation3], 4294963200  ;;  %v90_v0 = vlaneseq  ;;  %v2660_v1 = vmov 1983009808   ;;  %v2661_v3 = vmov 0   ;;  %v48_v7 = vld [vmem:[%s3367_s0] sm:$0xff] }
  0x14   :  { %v88_v2 = vunpack.c.l.s4 %v2660_v1  ;;  %166 = vmatprep.mubr.bf16.mxu0 %v2661_v3  ;;  %209 = vmatprep.mubr.bf16.mxu1 %v2661_v3  ;;  %vm115_vm0 = vcmask 1041408   ;;  %v86_v9 = vcombine.high %v48_v7, %v48_v7  ;;  %v2420_v10 = vld.sshfl [vmem:[%s3367_s0 + $0x8] sm:$0x33 pattern:$0x76325410]  ;;  %vm111_vm1 = vcmask 31744  }
  0x15   :  { %v2734_v4 = vshrl.u32 %v90_v0, 7  ;;  %2533 = vset.pattern.permute.xlu0 %v2661_v3  ;;  %2534 = vset.pattern.permute.xlu1 %v2661_v3  ;;  %v110_v14 = vcombine.high %v2420_v10, %v2420_v10  ;;  %v2536_v15 = vld [vmem:[%s3371_s4] sm:$0x3f]   ;;  %v129_v18 = vsel %vm115_vm0, %v2420_v10, 0  ;;  %v2537_v19 = vld [vmem:[%s3371_s4 + $0x4] sm:$0xfc]  }
  0x16   :  { %v89_v5 = vunpack.c.0.s8 %v88_v2  ;;  %v270_v20 = vrot.slane %v2537_v19, 2  ;;  %v2538_v21 = vld [vmem:[%s3371_s4 + $0xc] sm:$0x3f]   ;;  %v2413_v22 = vld [vmem:[%s3370_s3 + $0x2] ss:$8 sm:$0xf] }
  0x17   :  { %v2414_v23 = vld [vmem:[%s3370_s3 + $0x2] ss:$8 sm:$0x30]  ;;  %v2793_v25 = vsub.s32 1, %v2734_v4  ;;  %v2798_v27 = vsub.s32 2, %v2734_v4  ;;  %s2662_s14 = smov 2  }
  0x18   :  { %v92_v6 = vsub.s32 %v89_v5, %v2734_v4  ;;  %v2790_v24 = vor.u32 %v2414_v23, %v2413_v22  ;;  %v2804_v29 = vsub.s32 3, %v2734_v4  ;;  %v2810_v31 = vsub.s32 4, %v2734_v4  ;;  %s2663_s15 = smov 112   ;;  %s2664_s16 = smov 96  }
  0x19   :  { %vm421_vm2 = vcmask 916480   ;;  %vm631_vm3 = vcmask 785408   ;;  %vm800_vm4 = vcmask 15360   ;;  %s2665_s19 = smov 127   ;;  %s2666_s20 = smov 126   ;;  %vm745_vm5 = vcmask 1039360  }
  0x1a   :  { %v93_v8 = vrot.slane %v48_v7, %v92_v6  ;;  %v100_v13 = vrot.slane %v86_v9, %v92_v6  ;;  %v771_v26 = vrot.slane %v2790_v24, %v2793_v25  ;;  %v775_v28 = vrot.slane %v2790_v24, %v2798_v27 }
  0x1b   :  { %v779_v30 = vrot.slane %v2790_v24, %v2804_v29  ;;  %v783_v32 = vrot.slane %v2790_v24, %v2810_v31  ;;  %v2862_v7 = vsub.s32 0, %v2734_v4  ;;  %vm836_vm6 = vcmask 1031168  }
  0x1c   :  { %v101_v11 = vcombine.high %v93_v8, %v93_v8  ;;  %v117_v12 = vsel %vm115_vm0, %v93_v8, 0  ;;  %v102_v16 = vcombine.high %v100_v13, %v100_v13  ;;  %v123_v17 = vsel %vm115_vm0, %v100_v13, 0  ;;  %790 = vrot.lane.b32.xlu0 %v771_v26, %s2662_s14  ;;  %792 = vrot.lane.b32.xlu1 %v775_v28, %s2662_s14 }
  0x1d   :  { %v2866_v8 = vsub.s32 5, %v2734_v4  ;;  %v767_v9 = vrot.slane %v2790_v24, %v2862_v7  ;;  %vm1664_vm7 = vcmask 1043456   ;;  %vm2668_vm8 = vmmov 0  }
  0x1e   :  { %2421 = vmatprep.subr.msk.bf16.mxu0 %vm115_vm0, %v101_v11  ;;  %2423 = vmatprep.subr.msk.bf16.mxu1 %vm115_vm0, %v102_v16  ;;  %vm1660_vm9 = vcmask 64512  }
  0x1f   :  { %135 = vmatpush1.bf16.msra.mxu0 %v117_v12  ;;  %178 = vmatpush1.bf16.msra.mxu1 %v123_v17  ;;  %v787_v10 = vrot.slane %v2790_v24, %v2866_v8 }
  0x20   :  { %2425 = vmatprep.subr.msk.bf16.mxu0 %vm115_vm0, %v110_v14  ;;  %2428 = vmatprep.subr.msk.bf16.mxu1 %vm115_vm0, %v101_v11 }
  0x21   :  { %794 = vrot.lane.b32.xlu0 %v779_v30, %s2662_s14  ;;  %796 = vrot.lane.b32.xlu1 %v783_v32, %s2662_s14 }
  0x22   :  { %2422 = vmatmul.mubr.msk.bf16.vlgmr.msra.gmra.mrb[0].mxu0 %vm111_vm1, %v2536_v15  ;;  %2424 = vmatmul.mubr.msk.bf16.vlgmr.msra.gmra.mrb[0].mxu1 %vm111_vm1, %v2536_v15 }
  0x23   :  { %221 = vmatpush1.bf16.msra.mxu0 %v129_v18  ;;  %252 = vmatprep.mubr.bf16.mxu0 %v2661_v3 }
  0x24   :  { %2430 = vmatprep.subr.msk.bf16.mxu0 %vm115_vm0, %v102_v16  ;;  %275 = vmatpush1.bf16.msra.mxu1 %v117_v12 }
  0x25   :  { %306 = vmatprep.mubr.bf16.mxu1 %v2661_v3  ;;  %2432 = vmatprep.subr.msk.bf16.mxu1 %vm115_vm0, %v110_v14 }
  0x2a   :  { %2426 = vmatmul.mubr.msk.bf16.vlgmr.msra.gmra.mrb[4].mxu0 %vm111_vm1, %v2536_v15  ;;  %2429 = vmatmul.mubr.msk.bf16.vlgmr.msra.gmra.mrb[4].mxu1 %vm111_vm1, %v270_v20 }
  0x2b   :  { %318 = vmatpush1.bf16.msra.mxu0 %v123_v17  ;;  %349 = vmatprep.mubr.bf16.mxu0 %v2661_v3 }
  0x2c   :  { %2435 = vmatprep.subr.msk.bf16.mxu0 %vm115_vm0, %v101_v11  ;;  %361 = vmatpush1.bf16.msra.mxu1 %v129_v18  ;;  %v72_v11 = vld [vmem:[%s3374_s7] sm:$0xf] }
  0x2d   :  { %392 = vmatprep.mubr.bf16.mxu1 %v2661_v3  ;;  %2437 = vmatprep.subr.msk.bf16.mxu1 %vm115_vm0, %v102_v16 }
  0x32   :  { %2431 = vmatmul.mubr.msk.bf16.vlgmr.msra.gmra.mrb[8].mxu0 %vm111_vm1, %v270_v20  ;;  %2433 = vmatmul.mubr.msk.bf16.vlgmr.msra.gmra.mrb[8].mxu1 %vm111_vm1, %v270_v20 }
  0x33   :  { %485 = vmatpush1.bf16.msra.mxu0 %v117_v12  ;;  %516 = vmatprep.mubr.bf16.mxu0 %v2661_v3 }
  0x34   :  { %2439 = vmatprep.subr.msk.bf16.mxu0 %vm115_vm0, %v110_v14  ;;  %528 = vmatpush1.bf16.msra.mxu1 %v123_v17 }
  0x35   :  { %559 = vmatprep.mubr.bf16.mxu1 %v2661_v3 }
  0x3a   :  { %2436 = vmatmul.mubr.msk.bf16.vlgmr.msra.gmra.mrb[12].mxu0 %vm111_vm1, %v2538_v21  ;;  %2438 = vmatmul.mubr.msk.bf16.vlgmr.msra.gmra.mrb[12].mxu1 %vm111_vm1, %v2538_v21 }
  0x3b   :  { %571 = vmatpush1.bf16.msra.mxu0 %v129_v18  ;;  %602 = vmatprep.mubr.bf16.mxu0 %v2661_v3 }
  0x3c   :  { %975 = vmatprep.mubr.bf16.mxu1 %v2661_v3 }
  0x42   :  { %2440 = vmatmul.mubr.msk.bf16.vlgmr.msra.gmra.mrb[16].mxu0 %vm111_vm1, %v2538_v21 }
  0x43   :  { %1018 = vmatprep.mubr.bf16.mxu0 %v2661_v3 }
  0x8e   :  { %v793_v4 = vpop.permute.xlu1 %792  ;;  %v2879_v12 = vpop.permute.xlu0 %790 }
  0x93   :  { %v2881_v13 = vpop.permute.xlu1 %796  ;;  %v2883_v14 = vpop.permute.xlu0 %794 }
  0xf5   :  { %v2816_v33 = vpop.f32.mrb[0].mxu0  ;;  %v2822_v36 = vpop.f32.mrb[0].mxu1 }
  0xf6   :  { %v2818_v34 = vpop.f32.mrb[1].mxu0  ;;  %v2826_v38 = vpop.f32.mrb[1].mxu1 }
  0xf7   :  { %v2820_v35 = vpop.f32.mrb[2].mxu0  ;;  %v2828_v39 = vpop.f32.mrb[2].mxu1 }
  0xf8   :  { %v2824_v37 = vpop.f32.mrb[3].mxu0  ;;  %v2830_v40 = vpop.f32.mrb[3].mxu1 }
  0xfd   :  { %v2832_v41 = vpop.f32.mrb[4].mxu0  ;;  %v308_v44 = vpop.f32.mrb[4].mxu1 }
  0xfe   :  { %v2834_v42 = vpop.f32.mrb[5].mxu0  ;;  %409 = vrot.lane.b32.xlu0 %v308_v44, %s2663_s15  ;;  %v310_v46 = vpop.f32.mrb[5].mxu1 }
  0xff   :  { %v2836_v43 = vpop.f32.mrb[6].mxu0  ;;  %411 = vrot.lane.b32.xlu1 %v310_v46, %s2663_s15  ;;  %v312_v47 = vpop.f32.mrb[6].mxu1 }
 0x100   :  { %v2838_v45 = vpop.f32.mrb[7].mxu0  ;;  %v314_v48 = vpop.f32.mrb[7].mxu1 }
 0x102   :  { %445 = vrot.lane.b32.xlu0 %v312_v47, %s2663_s15 }
 0x103   :  { %447 = vrot.lane.b32.xlu1 %v314_v48, %s2663_s15 }
 0x105   :  { %v351_v49 = vpop.f32.mrb[8].mxu0  ;;  %v394_v52 = vpop.f32.mrb[8].mxu1 }
 0x106   :  { %v353_v50 = vpop.f32.mrb[9].mxu0  ;;  %413 = vrot.lane.b32.xlu0 %v351_v49, %s2663_s15  ;;  %v396_v54 = vpop.f32.mrb[9].mxu1 }
 0x107   :  { %v355_v51 = vpop.f32.mrb[10].mxu0  ;;  %417 = vrot.lane.b32.xlu1 %v394_v52, %s2663_s15  ;;  %v398_v55 = vpop.f32.mrb[10].mxu1 }
 0x108   :  { %v357_v53 = vpop.f32.mrb[11].mxu0  ;;  %v400_v56 = vpop.f32.mrb[11].mxu1 }
 0x10a   :  { %415 = vrot.lane.b32.xlu0 %v353_v50, %s2663_s15 }
 0x10b   :  { %419 = vrot.lane.b32.xlu1 %v396_v54, %s2663_s15 }
 0x10d   :  { %v518_v57 = vpop.f32.mrb[12].mxu0  ;;  %v561_v59 = vpop.f32.mrb[12].mxu1 }
 0x10e   :  { %v520_v58 = vpop.f32.mrb[13].mxu0  ;;  %449 = vrot.lane.b32.xlu0 %v355_v51, %s2663_s15  ;;  %v563_v61 = vpop.f32.mrb[13].mxu1 }
 0x10f   :  { %v522_v60 = vpop.f32.mrb[14].mxu0  ;;  %451 = vrot.lane.b32.xlu1 %v357_v53, %s2663_s15  ;;  %v565_v63 = vpop.f32.mrb[14].mxu1 }
 0x110   :  { %v524_v62 = vpop.f32.mrb[15].mxu0  ;;  %v567_v0 = vpop.f32.mrb[15].mxu1 }
 0x112   :  { %453 = vrot.lane.b32.xlu0 %v398_v55, %s2663_s15 }
 0x113   :  { %455 = vrot.lane.b32.xlu1 %v400_v56, %s2663_s15 }
 0x115   :  { %v604_v1 = vpop.f32.mrb[16].mxu0 }
 0x116   :  { %v606_v2 = vpop.f32.mrb[17].mxu0  ;;  %623 = vrot.lane.b32.xlu0 %v561_v59, %s2664_s16 }
 0x117   :  { %v608_v5 = vpop.f32.mrb[18].mxu0  ;;  %625 = vrot.lane.b32.xlu1 %v563_v61, %s2664_s16 }
 0x118   :  { %v610_v6 = vpop.f32.mrb[19].mxu0 }
 0x11a   :  { %659 = vrot.lane.b32.xlu0 %v565_v63, %s2664_s16 }
 0x11b   :  { %661 = vrot.lane.b32.xlu1 %v567_v0, %s2664_s16 }
 0x11e   :  { %627 = vrot.lane.b32.xlu0 %v604_v1, %s2664_s16 }
 0x11f   :  { %629 = vrot.lane.b32.xlu1 %v606_v2, %s2664_s16 }
 0x122   :  { %663 = vrot.lane.b32.xlu0 %v608_v5, %s2664_s16 }
 0x123   :  { %665 = vrot.lane.b32.xlu1 %v610_v6, %s2664_s16 }
 0x126   :  { %619 = vrot.lane.b32.xlu0 %v518_v57, %s2664_s16  ;;  %v802_v57 = vsel %vm800_vm4, %v2879_v12, %v793_v4 }
 0x127   :  { %621 = vrot.lane.b32.xlu1 %v520_v58, %s2664_s16 }
 0x12a   :  { %655 = vrot.lane.b32.xlu0 %v522_v60, %s2664_s16 }
 0x12b   :  { %657 = vrot.lane.b32.xlu1 %v524_v62, %s2664_s16 }
 0x12e   :  { %788 = vrot.lane.b32.xlu0 %v767_v9, %s2662_s14 }
 0x12f   :  { %798 = vrot.lane.b32.xlu1 %v787_v10, %s2662_s14 }
 0x132   :  { %856 = vperm.xlu0 %2533, %v72_v11  }
 0x170   :  { %v410_v15 = vpop.permute.xlu0 %409 }
 0x171   :  { %v412_v16 = vpop.permute.xlu1 %411 }
 0x174   :  { %v2885_v17 = vpop.permute.xlu0 %445 }
 0x175   :  { %v2887_v18 = vpop.permute.xlu1 %447 }
 0x178   :  { %v414_v19 = vpop.permute.xlu0 %413 }
 0x179   :  { %v418_v20 = vpop.permute.xlu1 %417 }
 0x17c   :  { %v416_v21 = vpop.permute.xlu0 %415 }
 0x17d   :  { %v2889_v22 = vpop.permute.xlu1 %419  ;;  %v424_v30 = vsel %vm421_vm2, %v414_v19, %v416_v21  ;;  %v425_v51 = vsel %vm421_vm2, %v416_v21, %v418_v20  ;;  %v422_v21 = vsel %vm421_vm2, %v410_v15, %v412_v16 }
 0x17e   :  { %v435_v44 = vadd.f32 %v424_v30, %v2822_v36  ;;  %v426_v36 = vsel %vm421_vm2, %v418_v20, %v2889_v22  ;;  %v436_v58 = vadd.f32 %v425_v51, %v2826_v38  ;;  %v433_v15 = vadd.f32 %v422_v21, %v2816_v33 }
 0x180   :  { %v450_v23 = vpop.permute.xlu0 %449 }
 0x181   :  { %v452_v24 = vpop.permute.xlu1 %451  ;;  %v458_v51 = vsel %vm421_vm2, %v2887_v18, %v450_v23 }
 0x182   :  { %v459_v47 = vsel %vm421_vm2, %v450_v23, %v452_v24 }
 0x183   :  { %v470_v52 = vadd.f32 %v459_v47, %v2828_v39  ;;  %v437_v39 = vadd.f32 %v426_v36, %v2832_v41 }
 0x184   :  { %v454_v26 = vpop.permute.xlu0 %453 }
 0x185   :  { %v2891_v28 = vpop.permute.xlu1 %455  ;;  %v460_v60 = vsel %vm421_vm2, %v452_v24, %v454_v26  ;;  %v423_v24 = vsel %vm421_vm2, %v412_v16, %v414_v19 }
 0x186   :  { %v461_v0 = vsel %vm421_vm2, %v454_v26, %v2891_v28  ;;  %v471_v38 = vadd.f32 %v460_v60, %v2830_v40  ;;  %v803_v40 = vsel %vm800_vm4, %v793_v4, %v2883_v14  ;;  %v434_v16 = vadd.f32 %v423_v24, %v2818_v34 }
 0x187   :  { %v472_v9 = vadd.f32 %v461_v0, %v2836_v43  ;;  %v804_v43 = vsel %vm800_vm4, %v2883_v14, %v2881_v13  ;;  %v457_v4 = vsel %vm421_vm2, %v2885_v17, %v2887_v18  ;;  %v469_v17 = vadd.f32 %v458_v51, %v2824_v37 }
 0x188   :  { %v624_v32 = vpop.permute.xlu0 %623  ;;  %v468_v34 = vadd.f32 %v457_v4, %v2820_v35 }
 0x189   :  { %v626_v46 = vpop.permute.xlu1 %625 }
 0x18a   :  { %v634_v48 = vsel %vm631_vm3, %v624_v32, %v626_v46 }
 0x18b   :  { %v2897_v49 = vadd.f32 %v634_v48, %v435_v44 }
 0x18c   :  { %v2899_v50 = vpop.permute.xlu0 %659 }
 0x18d   :  { %v662_v53 = vpop.permute.xlu1 %661  ;;  %v729_v54 = vrot.slane %v2897_v49, 4 }
 0x18e   :  { %v669_v55 = vsel %vm631_vm3, %v2899_v50, %v662_v53 }
 0x18f   :  { %v680_v56 = vadd.f32 %v669_v55, %v470_v52  ;;  %737 = vrot.lane.b32.xlu1 %v729_v54, %s2665_s19 }
 0x190   :  { %v628_v59 = vpop.permute.xlu0 %627 }
 0x191   :  { %v635_v61 = vsel %vm631_vm3, %v626_v46, %v628_v59  ;;  %v630_v62 = vpop.permute.xlu1 %629  ;;  %v814_v63 = vmul.f32 %v802_v57, %v680_v56  ;;  %v438_v56 = vadd.f32 %v2889_v22, %v2834_v42 }
 0x192   :  { %v2917_v1 = vadd.f32 %v635_v61, %v436_v58  ;;  %v636_v2 = vsel %vm631_vm3, %v628_v59, %v630_v62 }
 0x193   :  { %v2920_v5 = vadd.f32 %v636_v2, %v437_v39  ;;  %828 = vrot.lane.b32.xlu1 %v814_v63, %s2666_s20  ;;  %v2964_v37 = vadd.f32 %v630_v62, %v438_v56  ;;  %v2411_v2 = vld [vmem:[%s3370_s3 + $0x1] ss:$8 sm:$0xf] }
 0x194   :  { %v664_v41 = vpop.permute.xlu0 %663  ;;  %v730_v6 = vrot.slane %v2917_v1, 4 }
 0x195   :  { %v670_v10 = vsel %vm631_vm3, %v662_v53, %v664_v41  ;;  %v666_v11 = vpop.permute.xlu1 %665  ;;  %v731_v20 = vrot.slane %v2920_v5, 4  ;;  %v732_v62 = vrot.slane %v2964_v37, 4 }
 0x196   :  { %v681_v26 = vadd.f32 %v670_v10, %v471_v38  ;;  %v671_v30 = vsel %vm631_vm3, %v664_v41, %v666_v11  ;;  %v2412_v38 = vld [vmem:[%s3370_s3 + $0x1] ss:$8 sm:$0x30] }
 0x197   :  { %v682_v44 = vadd.f32 %v671_v30, %v472_v9  ;;  %739 = vrot.lane.b32.xlu1 %v730_v6, %s2665_s19  ;;  %741 = vrot.lane.b32.xlu0 %v731_v20, %s2665_s19  ;;  %v59_v9 = vor.u32 %v2412_v38, %v2411_v2 }
 0x198   :  { %v620_v46 = vpop.permute.xlu0 %619  ;;  %v815_v47 = vmul.f32 %v803_v40, %v681_v26  ;;  %v53_v40 = vld [vmem:[%s3370_s3] ss:$8 sm:$0xf] }
 0x199   :  { %v622_v19 = vpop.permute.xlu1 %621  ;;  %v816_v48 = vmul.f32 %v804_v43, %v682_v44  ;;  %v700_v20 = vrot.slane %v59_v9, %v2804_v29  ;;  %v54_v44 = vld [vmem:[%s3370_s3] ss:$8 sm:$0x30] }
 0x19a   :  { %v632_v52 = vsel %vm631_vm3, %v620_v46, %v622_v19  ;;  %v633_v53 = vsel %vm631_vm3, %v622_v19, %v624_v32  ;;  %v3011_v19 = vor.u32 %v54_v44, %v53_v40 }
 0x19b   :  { %v2947_v14 = vadd.f32 %v632_v52, %v433_v15  ;;  %v2949_v54 = vadd.f32 %v633_v53, %v434_v16  ;;  %830 = vrot.lane.b32.xlu0 %v815_v47, %s2666_s20  ;;  %832 = vrot.lane.b32.xlu1 %v816_v48, %s2666_s20  ;;  %v718_v46 = vmul.f32 %v700_v20, %v2917_v1 }
 0x19c   :  { %v656_v33 = vpop.permute.xlu0 %655  ;;  %v887_v1 = vrot.slane %v3011_v19, %v2804_v29 }
 0x19d   :  { %v658_v36 = vpop.permute.xlu1 %657  ;;  %v728_v18 = vrot.slane %v2949_v54, 4  ;;  %v727_v23 = vrot.slane %v2947_v14, 4 }
 0x19e   :  { %v667_v32 = vsel %vm631_vm3, %v656_v33, %v658_v36  ;;  %v668_v55 = vsel %vm631_vm3, %v658_v36, %v2899_v50  ;;  %v473_v50 = vadd.f32 %v2891_v28, %v2838_v45  ;;  %v2417_v45 = vld [vmem:[%s3370_s3 + $0x4] ss:$8 sm:$0xf]  ;;  %v688_v33 = vrot.slane %v59_v9, %v2862_v7 }
 0x19f   :  { %v678_v57 = vadd.f32 %v667_v32, %v468_v34  ;;  %v679_v58 = vadd.f32 %v668_v55, %v469_v17  ;;  %735 = vrot.lane.b32.xlu1 %v728_v18, %s2665_s19  ;;  %733 = vrot.lane.b32.xlu0 %v727_v23, %s2665_s19  ;;  %v692_v34 = vrot.slane %v59_v9, %v2793_v25 }
 0x1a0   :  { %v789_v35 = vpop.permute.xlu0 %788  ;;  %v683_v22 = vadd.f32 %v666_v11, %v473_v50  ;;  %v696_v11 = vrot.slane %v59_v9, %v2798_v27  ;;  %v883_v23 = vrot.slane %v3011_v19, %v2798_v27  ;;  %v704_v50 = vrot.slane %v59_v9, %v2810_v31 }
 0x1a1   :  { %v801_v59 = vsel %vm800_vm4, %v789_v35, %v2879_v12  ;;  %v812_v39 = vmul.f32 %v789_v35, %v678_v57  ;;  %v799_v60 = vpop.permute.xlu1 %798  ;;  %v2418_v12 = vld [vmem:[%s3370_s3 + $0x4] ss:$8 sm:$0x30]  ;;  %v716_v35 = vmul.f32 %v692_v34, %v2949_v54 }
 0x1a2   :  { %v813_v61 = vmul.f32 %v801_v59, %v679_v58  ;;  %v805_v42 = vsel %vm800_vm4, %v2881_v13, %v799_v60  ;;  %v2983_v13 = vor.u32 %v2418_v12, %v2417_v45  ;;  %v717_v43 = vmul.f32 %v696_v11, %v2897_v49 }
 0x1a3   :  { %824 = vrot.lane.b32.xlu0 %v812_v39, %s2666_s20  ;;  %v817_v63 = vmul.f32 %v805_v42, %v683_v22  ;;  %v715_v58 = vmul.f32 %v688_v33, %v2947_v14  ;;  %v708_v59 = vrot.slane %v59_v9, %v2866_v8  ;;  %v2539_v42 = vld [vmem:[%s3371_s4 + $0x10] sm:$0xfc]  }
 0x1a4   :  { %826 = vrot.lane.b32.xlu1 %v813_v61, %s2666_s20  ;;  %v1556_v28 = vrot.slane %v2983_v13, %v2862_v7  ;;  %v1560_v0 = vrot.slane %v2983_v13, %v2793_v25  ;;  %v921_v20 = vrot.slane %v2539_v42, 2  ;;  %v1568_v42 = vrot.slane %v2983_v13, %v2804_v29 }
 0x1a5   :  { %v720_v38 = vmul.f32 %v708_v59, %v2964_v37  ;;  %v1659_v59 = vld [vmem:[%s3373_s6] sm:$0x3] }
 0x1a7   :  { %743 = vrot.lane.b32.xlu0 %v732_v62, %s2665_s19 }
 0x1a8   :  { %834 = vrot.lane.b32.xlu1 %v817_v63, %s2666_s20 }
 0x1ab   :  { %1577 = vrot.lane.b32.xlu0 %v1556_v28, %s2662_s14  ;;  %v879_v28 = vrot.slane %v3011_v19, %v2793_v25 }
 0x1ac   :  { %1579 = vrot.lane.b32.xlu1 %v1560_v0, %s2662_s14 }
 0x1b0   :  { %1583 = vrot.lane.b32.xlu1 %v1568_v42, %s2662_s14 }
 0x1b1   :  { %v2997_v6 = vpop.permute.xlu0 %856 }
 0x201   :  { %v738_v41 = vpop.permute.xlu1 %737 }
 0x205   :  { %v829_v10 = vpop.permute.xlu1 %828 }
 0x209   :  { %v742_v21 = vpop.permute.xlu0 %741  ;;  %v740_v24 = vpop.permute.xlu1 %739 }
 0x20a   :  { %v748_v26 = vsel %vm745_vm5, %v738_v41, %v740_v24  ;;  %v749_v30 = vsel %vm745_vm5, %v740_v24, %v742_v21 }
 0x20b   :  { %v759_v47 = vadd.f32 %v748_v26, %v717_v43  ;;  %v760_v15 = vadd.f32 %v749_v30, %v718_v46 }
 0x20d   :  { %v831_v16 = vpop.permute.xlu0 %830  ;;  %v833_v48 = vpop.permute.xlu1 %832 }
 0x20e   :  { %v839_v4 = vsel %vm836_vm6, %v829_v10, %v831_v16  ;;  %v840_v51 = vsel %vm836_vm6, %v831_v16, %v833_v48 }
 0x20f   :  { %v850_v52 = vadd.f32 %v839_v4, %v759_v47  ;;  %v851_v53 = vadd.f32 %v840_v51, %v760_v15  ;;  %v895_v4 = vrot.slane %v3011_v19, %v2866_v8 }
 0x211   :  { %v861_v49 = vadd.f32 %v2997_v6, %v850_v52  ;;  %v862_v17 = vadd.f32 %v2997_v6, %v851_v53  ;;  %v734_v36 = vpop.permute.xlu0 %733  ;;  %v736_v18 = vpop.permute.xlu1 %735 }
 0x212   :  { %v746_v56 = vsel %vm745_vm5, %v734_v36, %v736_v18  ;;  %v747_v57 = vsel %vm745_vm5, %v736_v18, %v738_v41  ;;  %v719_v41 = vmul.f32 %v704_v50, %v2920_v5  ;;  %v2542_v50 = vld [vmem:[#allocation2] ss:$16 sps:$4 sm:$0xff]  }
 0x213   :  { %v867_v32 = vmax.f32 %v861_v49, 0.0  ;;  %v868_v55 = vmax.f32 %v862_v17, 0.0  ;;  %v757_v22 = vadd.f32 %v746_v56, %v715_v58  ;;  %v758_v62 = vadd.f32 %v747_v57, %v716_v35  ;;  %v50_v56 = vld [vmem:[%s3368_s1] sm:$0xf]  ;;  %v2547_v35 = vld [vmem:[#allocation2 + $0xc] ss:$16 sps:$4 sm:$0xff]  }
 0x214   :  { %v1666_v58 = vsel %vm1664_vm7, %v50_v56, 0 }
 0x215   :  { %v905_v39 = vmul.f32 %v887_v1, %v868_v55  ;;  %v825_v60 = vpop.permute.xlu0 %824  ;;  %v904_v61 = vmul.f32 %v883_v23, %v867_v32  ;;  %v2541_v32 = vld [vmem:[%s3371_s4 + $0x1c] sm:$0xfc]   ;;  %v2667_v55 = vmov 0.0  }
 0x216   :  { %v827_v63 = vpop.permute.xlu1 %826  ;;  %v1288_v57 = vrot.slane %v2541_v32, 2 }
 0x217   :  { %v837_v45 = vsel %vm836_vm6, %v825_v60, %v827_v63  ;;  %v838_v14 = vsel %vm836_vm6, %v827_v63, %v829_v10  ;;  %v911_v12 = vpack.c.bf16 %v905_v39, %v905_v39  ;;  %v910_v54 = vpack.c.bf16 %v904_v61, %v904_v61  ;;  %v2544_v39 = vld [vmem:[#allocation2 + $0x4] ss:$16 sps:$4 sm:$0xff]   ;;  %v2545_v60 = vld [vmem:[#allocation2 + $0x8] ss:$16 sps:$4 sm:$0xff]  }
 0x218   :  { %v848_v0 = vadd.f32 %v837_v45, %v757_v22  ;;  %v849_v2 = vadd.f32 %v838_v14, %v758_v62  ;;  %v875_v10 = vrot.slane %v3011_v19, %v2862_v7  ;;  %v1564_v61 = vrot.slane %v2983_v13, %v2798_v27  ;;  %v2548_v22 = vld [vmem:[#allocation2 + $0x20] ss:$16 sps:$4 sm:$0xff]   ;;  %v2550_v62 = vld [vmem:[#allocation2 + $0x24] ss:$16 sps:$4 sm:$0xff]   ;;  %v2551_v63 = vld [vmem:[#allocation2 + $0x28] ss:$16 sps:$4 sm:$0xff]  }
 0x219   :  { %v744_v9 = vpop.permute.xlu0 %743  ;;  %2444 = vmatprep.subr.msk.bf16.mxu0 %vm115_vm0, %v911_v12  ;;  %v932_v11 = vsel %vm115_vm0, %v910_v54, 0  ;;  %v2553_v45 = vld [vmem:[#allocation2 + $0x2c] ss:$16 sps:$4 sm:$0xff]   ;;  %v2554_v14 = vld [vmem:[#allocation2 + $0x40] ss:$16 sps:$4 sm:$0xff]  }
 0x21a   :  { %v859_v24 = vadd.f32 %v2997_v6, %v848_v0  ;;  %v860_v26 = vadd.f32 %v2997_v6, %v849_v2  ;;  %v750_v30 = vsel %vm745_vm5, %v742_v21, %v744_v9  ;;  %v762_v40 = vadd.f32 %v744_v9, %v720_v38  ;;  %987 = vmatpush1.bf16.msra.mxu0 %v932_v11  ;;  %v835_v37 = vpop.permute.xlu1 %834  ;;  %v2557_v54 = vld [vmem:[#allocation2 + $0x48] ss:$16 sps:$4 sm:$0xff]   ;;  %v2562_v27 = vld [vmem:[#allocation2 + $0x64] ss:$16 sps:$4 sm:$0xff]   ;;  %v2565_v0 = vld [vmem:[#allocation2 + $0x6c] ss:$16 sps:$4 sm:$0xff]  }
 0x21b   :  { %v761_v44 = vadd.f32 %v750_v30, %v719_v41  ;;  %v841_v5 = vsel %vm836_vm6, %v833_v48, %v835_v37  ;;  %v891_v48 = vrot.slane %v3011_v19, %v2810_v31  ;;  %1581 = vrot.lane.b32.xlu0 %v1564_v61, %s2662_s14  ;;  %v2560_v2 = vld [vmem:[#allocation2 + $0x60] ss:$16 sps:$4 sm:$0xff]   ;;  %v2563_v38 = vld [vmem:[#allocation2 + $0x68] ss:$16 sps:$4 sm:$0xff]   ;;  %v2568_v9 = vld [vmem:[#allocation2 + $0x84] ss:$16 sps:$4 sm:$0xff]  }
 0x21c   :  { %v865_v43 = vmax.f32 %v859_v24, 0.0  ;;  %v866_v46 = vmax.f32 %v860_v26, 0.0  ;;  %v853_v47 = vadd.f32 %v835_v37, %v762_v40  ;;  %v2566_v41 = vld [vmem:[#allocation2 + $0x80] ss:$16 sps:$4 sm:$0xff]   ;;  %v2577_v24 = vld [vmem:[#allocation2 + $0xac] ss:$16 sps:$4 sm:$0xff]  }
 0x21d   :  { %v852_v15 = vadd.f32 %v841_v5, %v761_v44  ;;  %2445 = vmatmul.mubr.msk.bf16.vlgmr.msra.gmra.mrb[20].mxu0 %vm111_vm1, %v921_v20  ;;  %v2572_v26 = vld [vmem:[#allocation2 + $0xa0] ss:$16 sps:$4 sm:$0xff]   ;;  %v2575_v30 = vld [vmem:[#allocation2 + $0xa8] ss:$16 sps:$4 sm:$0xff]   ;;  %v2580_v37 = vld [vmem:[#allocation2 + $0xc4] ss:$16 sps:$4 sm:$0xff]  }
 0x21e   :  { %v903_v16 = vmul.f32 %v879_v28, %v866_v46  ;;  %v864_v51 = vadd.f32 %v2997_v6, %v853_v47  ;;  %v902_v52 = vmul.f32 %v875_v10, %v865_v43  ;;  %1114 = vmatprep.mubr.bf16.mxu0 %v2661_v3  ;;  %v2559_v28 = vld [vmem:[#allocation2 + $0x4c] ss:$16 sps:$4 sm:$0xff]   ;;  %v2574_v10 = vld [vmem:[#allocation2 + $0xa4] ss:$16 sps:$4 sm:$0xff]   ;;  %v2578_v40 = vld [vmem:[#allocation2 + $0xc0] ss:$16 sps:$4 sm:$0xff]  }
 0x21f   :  { %v863_v21 = vadd.f32 %v2997_v6, %v852_v15  ;;  %v2540_v6 = vld [vmem:[%s3371_s4 + $0x18] sm:$0x3f]   ;;  %v2584_v43 = vld [vmem:[#allocation2 + $0xe0] ss:$16 sps:$4 sm:$0xff]   ;;  %v2586_v46 = vld [vmem:[#allocation2 + $0xe4] ss:$16 sps:$4 sm:$0xff]  }
 0x220   :  { %v870_v53 = vmax.f32 %v864_v51, 0.0  ;;  %v909_v33 = vpack.c.bf16 %v903_v16, %v903_v16  ;;  %v908_v34 = vpack.c.bf16 %v902_v52, %v902_v52  ;;  %v2581_v44 = vld [vmem:[#allocation2 + $0xc8] ss:$16 sps:$4 sm:$0xff]   ;;  %v2583_v5 = vld [vmem:[#allocation2 + $0xcc] ss:$16 sps:$4 sm:$0xff]  }
 0x221   :  { %v869_v49 = vmax.f32 %v863_v21, 0.0  ;;  %v2587_v47 = vld [vmem:[#allocation2 + $0xe8] ss:$16 sps:$4 sm:$0xff]   ;;  %v2589_v15 = vld [vmem:[#allocation2 + $0xec] ss:$16 sps:$4 sm:$0xff]  }
 0x222   :  { %v907_v1 = vmul.f32 %v895_v4, %v870_v53  ;;  %2442 = vmatprep.subr.msk.bf16.mxu1 %vm115_vm0, %v909_v33  ;;  %2449 = vmatprep.subr.msk.bf16.mxu0 %vm115_vm0, %v909_v33  ;;  %v926_v17 = vsel %vm115_vm0, %v908_v34, 0 }
 0x223   :  { %944 = vmatpush1.bf16.msra.mxu1 %v926_v17  ;;  %1083 = vmatpush1.bf16.msra.mxu0 %v926_v17  ;;  %v906_v36 = vmul.f32 %v891_v48, %v869_v49 }
 0x224   :  { %v913_v18 = vpack.c.bf16 %v907_v1, %v907_v1 }
 0x225   :  { %v912_v19 = vpack.c.bf16 %v906_v36, %v906_v36 }
 0x226   :  { %2443 = vmatmul.mubr.msk.bf16.vlgmr.msra.gmra.mrb[16].mxu1 %vm111_vm1, %v921_v20  ;;  %2446 = vmatprep.subr.msk.bf16.mxu1 %vm115_vm0, %v913_v18 }
 0x227   :  { %2450 = vmatmul.mubr.msk.bf16.vlgmr.msra.gmra.mrb[24].mxu0 %vm111_vm1, %v2540_v6  ;;  %2453 = vmatprep.subr.msk.bf16.mxu0 %vm115_vm0, %v913_v18  ;;  %v938_v23 = vsel %vm115_vm0, %v912_v19, 0 }
 0x228   :  { %1030 = vmatpush1.bf16.msra.mxu1 %v938_v23  ;;  %1169 = vmatpush1.bf16.msra.mxu0 %v938_v23 }
 0x229   :  { %2451 = vmatprep.subr.msk.bf16.mxu1 %vm115_vm0, %v911_v12  ;;  %2458 = vmatprep.subr.msk.bf16.mxu0 %vm115_vm0, %v911_v12  ;;  %v2556_v12 = vld [vmem:[#allocation2 + $0x44] ss:$16 sps:$4 sm:$0xff]  }
 0x22a   :  { %1061 = vmatprep.mubr.bf16.mxu1 %v2661_v3  ;;  %1200 = vmatprep.mubr.bf16.mxu0 %v2661_v3 }
 0x22e   :  { %2447 = vmatmul.mubr.msk.bf16.vlgmr.msra.gmra.mrb[20].mxu1 %vm111_vm1, %v921_v20  ;;  %v2571_v20 = vld [vmem:[#allocation2 + $0x8c] ss:$16 sps:$4 sm:$0xff]  }
 0x22f   :  { %1126 = vmatpush1.bf16.msra.mxu1 %v932_v11  ;;  %2454 = vmatmul.mubr.msk.bf16.vlgmr.msra.gmra.mrb[28].mxu0 %vm111_vm1, %v2540_v6 }
 0x230   :  { %1336 = vmatpush1.bf16.msra.mxu0 %v932_v11  ;;  %2456 = vmatprep.subr.msk.bf16.mxu1 %vm115_vm0, %v909_v33  ;;  %v2569_v11 = vld [vmem:[#allocation2 + $0x88] ss:$16 sps:$4 sm:$0xff]  }
 0x231   :  { %1157 = vmatprep.mubr.bf16.mxu1 %v2661_v3  ;;  %1367 = vmatprep.mubr.bf16.mxu0 %v2661_v3 }
 0x232   :  { %2514 = vmatprep.subr.bf16.mxu0 %v2667_v55 }
 0x236   :  { %2452 = vmatmul.mubr.msk.bf16.vlgmr.msra.gmra.mrb[24].mxu1 %vm111_vm1, %v2540_v6 }
 0x237   :  { %1293 = vmatpush1.bf16.msra.mxu1 %v926_v17  ;;  %2459 = vmatmul.mubr.msk.bf16.vlgmr.msra.gmra.mrb[32].mxu0 %vm111_vm1, %v1288_v57 }
 0x238   :  { %2460 = vmatprep.subr.msk.bf16.mxu1 %vm115_vm0, %v913_v18  ;;  %2515 = vmatpush3.bf16.msra.mxu0 %v1666_v58 }
 0x239   :  { %1324 = vmatprep.mubr.bf16.mxu1 %v2661_v3  ;;  %2516 = vmatprep.mubr.msk.bf16.mxu0 %vm2668_vm8, %v2667_v55 }
 0x23a   :  { %1947 = vmatprep.subr.bf16.mxu0 %v2547_v35 }
 0x23e   :  { %2457 = vmatmul.mubr.msk.bf16.vlgmr.msra.gmra.mrb[28].mxu1 %vm111_vm1, %v1288_v57 }
 0x23f   :  { %1379 = vmatpush1.bf16.msra.mxu1 %v938_v23  ;;  %2517 = vmatmul.mubr.msk.bf16.vlgmr.msra.gmra.mrb[36].mxu0 %vm1660_vm9, %v1659_v59 }
 0x240   :  { %1410 = vmatprep.mubr.bf16.mxu1 %v2661_v3  ;;  %1906 = vmatprep.subr.bf16.mxu1 %v2544_v39 }
 0x241   :  { %1948 = vmatpush1.bf16.msra.mxu0 %v2545_v60  ;;  %1979 = vmatprep.mubr.bf16.mxu0 %v2661_v3 }
 0x242   :  { %1949 = vmatprep.subr.bf16.mxu0 %v2553_v45 }
 0x245   :  { %1950 = vmatpush1.bf16.msra.mxu0 %v2551_v63 }
 0x246   :  { %2461 = vmatmul.mubr.msk.bf16.vlgmr.msra.gmra.mrb[32].mxu1 %vm111_vm1, %v1288_v57  ;;  %1951 = vmatprep.subr.bf16.mxu0 %v2559_v28 }
 0x247   :  { %1907 = vmatpush1.bf16.msra.mxu1 %v2542_v50  ;;  %1938 = vmatprep.mubr.bf16.mxu1 %v2661_v3 }
 0x248   :  { %1908 = vmatprep.subr.bf16.mxu1 %v2550_v62 }
 0x249   :  { %1952 = vmatpush1.bf16.msra.mxu0 %v2557_v54 }
 0x24a   :  { %1953 = vmatprep.subr.bf16.mxu0 %v2565_v0 }
 0x24b   :  { %1909 = vmatpush1.bf16.msra.mxu1 %v2548_v22 }
 0x24c   :  { %1910 = vmatprep.subr.bf16.mxu1 %v2556_v12 }
 0x24d   :  { %1954 = vmatpush1.bf16.msra.mxu0 %v2563_v38 }
 0x24e   :  { %1955 = vmatprep.subr.bf16.mxu0 %v2571_v20  ;;  %v73_v20 = vld [vmem:[%s3374_s7 + $0x4] sm:$0xf] }
 0x24f   :  { %1911 = vmatpush1.bf16.msra.mxu1 %v2554_v14 }
 0x250   :  { %1912 = vmatprep.subr.bf16.mxu1 %v2562_v27 }
 0x251   :  { %1956 = vmatpush1.bf16.msra.mxu0 %v2569_v11  ;;  %v74_v11 = vld [vmem:[%s3374_s7 + $0x8] sm:$0xf] }
 0x252   :  { %1957 = vmatprep.subr.bf16.mxu0 %v2577_v24  ;;  %v3163_v24 = vpop.permute.xlu1 %1579 }
 0x253   :  { %1913 = vmatpush1.bf16.msra.mxu1 %v2560_v2 }
 0x254   :  { %1914 = vmatprep.subr.bf16.mxu1 %v2568_v9  ;;  %v1576_v9 = vrot.slane %v2983_v13, %v2866_v8 }
 0x255   :  { %1958 = vmatpush1.bf16.msra.mxu0 %v2575_v30 }
 0x256   :  { %1959 = vmatprep.subr.bf16.mxu0 %v2583_v5  ;;  %v3167_v8 = vpop.permute.xlu1 %1583 }
 0x257   :  { %1915 = vmatpush1.bf16.msra.mxu1 %v2566_v41  ;;  %v1572_v41 = vrot.slane %v2983_v13, %v2810_v31 }
 0x258   :  { %1916 = vmatprep.subr.bf16.mxu1 %v2574_v10  ;;  %v3161_v10 = vpop.permute.xlu0 %1577 }
 0x259   :  { %1960 = vmatpush1.bf16.msra.mxu0 %v2581_v44 }
 0x25a   :  { %1961 = vmatprep.subr.bf16.mxu0 %v2589_v15 }
 0x25b   :  { %1917 = vmatpush1.bf16.msra.mxu1 %v2572_v26 }
 0x25c   :  { %1918 = vmatprep.subr.bf16.mxu1 %v2580_v37 }
 0x25d   :  { %1962 = vmatpush1.bf16.msra.mxu0 %v2587_v47 }
 0x25f   :  { %1919 = vmatpush1.bf16.msra.mxu1 %v2578_v40 }
 0x260   :  { %1920 = vmatprep.subr.bf16.mxu1 %v2586_v46 }
 0x263   :  { %1921 = vmatpush1.bf16.msra.mxu1 %v2584_v43 }
 0x28d   :  { %v3165_v26 = vpop.permute.xlu0 %1581 }
 0x2f0   :  { %v3099_v16 = vpop.f32.mrb[20].mxu0 }
 0x2f1   :  { %v3101_v4 = vpop.f32.mrb[21].mxu0 }
 0x2f2   :  { %v3103_v51 = vpop.f32.mrb[22].mxu0 }
 0x2f3   :  { %v3105_v52 = vpop.f32.mrb[23].mxu0 }
 0x2f9   :  { %v3107_v21 = vpop.f32.mrb[16].mxu1 }
 0x2fa   :  { %v1116_v48 = vpop.f32.mrb[24].mxu0  ;;  %v3109_v53 = vpop.f32.mrb[17].mxu1 }
 0x2fb   :  { %v1118_v33 = vpop.f32.mrb[25].mxu0  ;;  %1217 = vrot.lane.b32.xlu0 %v1116_v48, %s2663_s15  ;;  %v3112_v34 = vpop.f32.mrb[18].mxu1 }
 0x2fc   :  { %1219 = vrot.lane.b32.xlu1 %v1118_v33, %s2663_s15  ;;  %v3115_v49 = vpop.f32.mrb[19].mxu1  ;;  %v1120_v1 = vpop.f32.mrb[26].mxu0 }
 0x2fd   :  { %v1122_v17 = vpop.f32.mrb[27].mxu0 }
 0x301   :  { %v3117_v6 = vpop.f32.mrb[20].mxu1 }
 0x302   :  { %v3119_v36 = vpop.f32.mrb[21].mxu1  ;;  %v1202_v18 = vpop.f32.mrb[28].mxu0 }
 0x303   :  { %v3121_v19 = vpop.f32.mrb[22].mxu1  ;;  %v1204_v23 = vpop.f32.mrb[29].mxu0 }
 0x304   :  { %v3123_v32 = vpop.f32.mrb[23].mxu1  ;;  %v1206_v55 = vpop.f32.mrb[30].mxu0 }
 0x305   :  { %v1208_v56 = vpop.f32.mrb[31].mxu0 }
 0x309   :  { %v1159_v57 = vpop.f32.mrb[24].mxu1 }
 0x30a   :  { %1221 = vrot.lane.b32.xlu0 %v1159_v57, %s2663_s15  ;;  %v1161_v58 = vpop.f32.mrb[25].mxu1  ;;  %v1369_v35 = vpop.f32.mrb[32].mxu0 }
 0x30b   :  { %1223 = vrot.lane.b32.xlu1 %v1161_v58, %s2663_s15  ;;  %v1163_v59 = vpop.f32.mrb[26].mxu1  ;;  %v1371_v39 = vpop.f32.mrb[33].mxu0 }
 0x30c   :  { %v1165_v60 = vpop.f32.mrb[27].mxu1  ;;  %v1373_v50 = vpop.f32.mrb[34].mxu0 }
 0x30d   :  { %v1375_v61 = vpop.f32.mrb[35].mxu0 }
 0x30e   :  { %1252 = vrot.lane.b32.xlu0 %v1120_v1, %s2663_s15 }
 0x30f   :  { %1254 = vrot.lane.b32.xlu1 %v1122_v17, %s2663_s15 }
 0x311   :  { %v1326_v42 = vpop.f32.mrb[28].mxu1 }
 0x312   :  { %v1702_v22 = vpop.f32.mrb[36].mxu0  ;;  %1256 = vrot.lane.b32.xlu0 %v1163_v59, %s2663_s15  ;;  %v1328_v62 = vpop.f32.mrb[29].mxu1 }
 0x313   :  { %v1708_v63 = vpack.c.bf16 %v1702_v22, %v1702_v22  ;;  %1258 = vrot.lane.b32.xlu1 %v1165_v60, %s2663_s15  ;;  %v1330_v45 = vpop.f32.mrb[30].mxu1  ;;  %v2518_v14 = vpop.f32.mrb[37].mxu0 }
 0x314   :  { %v1332_v12 = vpop.f32.mrb[31].mxu1  ;;  %v1705_v54 = vpop.f32.mrb[38].mxu0 }
 0x315   :  { %1939 = vmatmul.mubr.bf16.vlgmr.msra.gmra.mrb[36].mxu1 %v1708_v63  ;;  %1980 = vmatmul.mubr.bf16.vlgmr.msra.gmra.mrb[40].mxu0 %v1708_v63  ;;  %v2519_v28 = vpop.f32.mrb[39].mxu0 }
 0x316   :  { %1225 = vrot.lane.b32.xlu0 %v1202_v18, %s2663_s15  ;;  %2054 = vmatprep.mubr.bf16.mxu1 %v2661_v3 }
 0x317   :  { %1227 = vrot.lane.b32.xlu1 %v1204_v23, %s2663_s15  ;;  %2095 = vmatprep.mubr.bf16.mxu0 %v2661_v3 }
 0x319   :  { %v1412_v27 = vpop.f32.mrb[32].mxu1 }
 0x31a   :  { %1260 = vrot.lane.b32.xlu0 %v1206_v55, %s2663_s15  ;;  %v1414_v0 = vpop.f32.mrb[33].mxu1 }
 0x31b   :  { %1262 = vrot.lane.b32.xlu1 %v1208_v56, %s2663_s15  ;;  %v1416_v2 = vpop.f32.mrb[34].mxu1 }
 0x31c   :  { %v1418_v38 = vpop.f32.mrb[35].mxu1 }
 0x31e   :  { %1427 = vrot.lane.b32.xlu0 %v1326_v42, %s2664_s16 }
 0x31f   :  { %1429 = vrot.lane.b32.xlu1 %v1328_v62, %s2664_s16 }
 0x322   :  { %1462 = vrot.lane.b32.xlu0 %v1330_v45, %s2664_s16 }
 0x323   :  { %1464 = vrot.lane.b32.xlu1 %v1332_v12, %s2664_s16 }
 0x326   :  { %1431 = vrot.lane.b32.xlu0 %v1369_v35, %s2664_s16 }
 0x327   :  { %1433 = vrot.lane.b32.xlu1 %v1371_v39, %s2664_s16 }
 0x32a   :  { %1435 = vrot.lane.b32.xlu0 %v1412_v27, %s2664_s16 }
 0x32b   :  { %1437 = vrot.lane.b32.xlu1 %v1414_v0, %s2664_s16 }
 0x32e   :  { %1466 = vrot.lane.b32.xlu0 %v1373_v50, %s2664_s16 }
 0x32f   :  { %1468 = vrot.lane.b32.xlu1 %v1375_v61, %s2664_s16 }
 0x332   :  { %1470 = vrot.lane.b32.xlu0 %v1416_v2, %s2664_s16 }
 0x333   :  { %1472 = vrot.lane.b32.xlu1 %v1418_v38, %s2664_s16 }
 0x336   :  { %1585 = vrot.lane.b32.xlu0 %v1572_v41, %s2662_s14 }
 0x337   :  { %1587 = vrot.lane.b32.xlu1 %v1576_v9, %s2662_s14 }
 0x33a   :  { %1743 = vperm.xlu0 %2533, %v74_v11  }
 0x33b   :  { %1638 = vperm.xlu1 %2534, %v73_v20  }
 0x36d   :  { %v1218_v13 = vpop.permute.xlu0 %1217 }
 0x36e   :  { %v1220_v30 = vpop.permute.xlu1 %1219 }
 0x36f   :  { %v1229_v1 = vsel %vm421_vm2, %v1218_v13, %v1220_v30 }
 0x370   :  { %v1237_v18 = vadd.f32 %v1229_v1, %v3107_v21 }
 0x37c   :  { %v1222_v40 = vpop.permute.xlu0 %1221 }
 0x37d   :  { %v1224_v37 = vpop.permute.xlu1 %1223  ;;  %v1230_v35 = vsel %vm421_vm2, %v1220_v30, %v1222_v40 }
 0x37e   :  { %v1241_v50 = vsel %vm421_vm2, %v1222_v40, %v1224_v37  ;;  %v1238_v42 = vadd.f32 %v1230_v35, %v3109_v53 }
 0x37f   :  { %v1244_v62 = vadd.f32 %v1241_v50, %v3099_v16 }
 0x380   :  { %v1253_v44 = vpop.permute.xlu0 %1252 }
 0x381   :  { %v1255_v5 = vpop.permute.xlu1 %1254 }
 0x382   :  { %v1264_v55 = vsel %vm421_vm2, %v1253_v44, %v1255_v5 }
 0x383   :  { %v1275_v59 = vadd.f32 %v1264_v55, %v3112_v34 }
 0x384   :  { %v1257_v43 = vpop.permute.xlu0 %1256 }
 0x385   :  { %v1259_v46 = vpop.permute.xlu1 %1258 }
 0x386   :  { %v1266_v11 = vsel %vm421_vm2, %v1257_v43, %v1259_v46 }
 0x388   :  { %v1226_v47 = vpop.permute.xlu0 %1225 }
 0x389   :  { %v1228_v15 = vpop.permute.xlu1 %1227  ;;  %v1231_v63 = vsel %vm421_vm2, %v1224_v37, %v1226_v47 }
 0x38a   :  { %v1232_v12 = vsel %vm421_vm2, %v1226_v47, %v1228_v15  ;;  %v1239_v53 = vadd.f32 %v1231_v63, %v3101_v4  ;;  %v1245_v20 = vadd.f32 %v1228_v15, %v3119_v36  ;;  %v1265_v4 = vsel %vm421_vm2, %v1255_v5, %v1257_v43 }
 0x38b   :  { %v1240_v2 = vadd.f32 %v1232_v12, %v3117_v6  ;;  %v1277_v47 = vadd.f32 %v1266_v11, %v3103_v51  ;;  %v1590_v51 = vsel %vm800_vm4, %v3163_v24, %v3165_v26 }
 0x38c   :  { %v1261_v48 = vpop.permute.xlu0 %1260 }
 0x38d   :  { %v3169_v33 = vpop.permute.xlu1 %1262 }
 0x38e   :  { %v1268_v5 = vsel %vm421_vm2, %v1261_v48, %v3169_v33 }
 0x390   :  { %v1428_v17 = vpop.permute.xlu0 %1427 }
 0x391   :  { %v1430_v23 = vpop.permute.xlu1 %1429 }
 0x392   :  { %v1439_v56 = vsel %vm631_vm3, %v1428_v17, %v1430_v23  ;;  %v1276_v17 = vadd.f32 %v1265_v4, %v3115_v49  ;;  %v1279_v49 = vadd.f32 %v1268_v5, %v3121_v19 }
 0x393   :  { %v3175_v57 = vadd.f32 %v1439_v56, %v1237_v18  ;;  %v1267_v18 = vsel %vm421_vm2, %v1259_v46, %v1261_v48  ;;  %v1589_v48 = vsel %vm800_vm4, %v3161_v10, %v3163_v24 }
 0x394   :  { %v1463_v58 = vpop.permute.xlu0 %1462 }
 0x395   :  { %v1465_v39 = vpop.permute.xlu1 %1464  ;;  %v1522_v60 = vrot.slane %v3175_v57, 4 }
 0x396   :  { %v1474_v61 = vsel %vm631_vm3, %v1463_v58, %v1465_v39 }
 0x397   :  { %v1485_v21 = vadd.f32 %v1474_v61, %v1275_v59  ;;  %1528 = vrot.lane.b32.xlu0 %v1522_v60, %s2665_s19  ;;  %v1278_v60 = vadd.f32 %v1267_v18, %v3105_v52  ;;  %v1591_v52 = vsel %vm800_vm4, %v3165_v26, %v3167_v8 }
 0x398   :  { %v1432_v22 = vpop.permute.xlu0 %1431 }
 0x399   :  { %v1440_v45 = vsel %vm631_vm3, %v1430_v23, %v1432_v22  ;;  %v1434_v34 = vpop.permute.xlu1 %1433  ;;  %v1600_v14 = vmul.f32 %v3161_v10, %v1485_v21  ;;  %v1280_v10 = vadd.f32 %v3169_v33, %v3123_v32  ;;  %v76_v32 = vld [vmem:[%s3374_s7 + $0x10] sm:$0x1] }
 0x39a   :  { %v3189_v54 = vadd.f32 %v1440_v45, %v1238_v42  ;;  %v1451_v28 = vsel %vm631_vm3, %v1432_v22, %v1434_v34  ;;  %v75_v45 = vld [vmem:[%s3374_s7 + $0xc] sm:$0xf] }
 0x39b   :  { %v1454_v27 = vadd.f32 %v1451_v28, %v1244_v62  ;;  %1612 = vrot.lane.b32.xlu0 %v1600_v14, %s2666_s20 }
 0x39c   :  { %v1436_v0 = vpop.permute.xlu0 %1435  ;;  %v1523_v16 = vrot.slane %v3189_v54, 4 }
 0x39d   :  { %v1524_v38 = vrot.slane %v1454_v27, 4  ;;  %v1441_v41 = vsel %vm631_vm3, %v1434_v34, %v1436_v0  ;;  %v1438_v9 = vpop.permute.xlu1 %1437 }
 0x39e   :  { %v3199_v13 = vadd.f32 %v1441_v41, %v1239_v53  ;;  %v1442_v30 = vsel %vm631_vm3, %v1436_v0, %v1438_v9  ;;  %1530 = vrot.lane.b32.xlu1 %v1523_v16, %s2665_s19  ;;  %v1455_v6 = vadd.f32 %v1438_v9, %v1245_v20 }
 0x39f   :  { %v3204_v40 = vadd.f32 %v1442_v30, %v1240_v2  ;;  %1532 = vrot.lane.b32.xlu0 %v1524_v38, %s2665_s19 }
 0x3a0   :  { %v1467_v37 = vpop.permute.xlu0 %1466  ;;  %v1525_v44 = vrot.slane %v3199_v13, 4  ;;  %v1527_v55 = vrot.slane %v1455_v6, 4  ;;  %v2591_v6 = vld [vmem:[%s3372_s5] ss:$0 sps:$4 sm:$0xcc]  }
 0x3a1   :  { %v1475_v36 = vsel %vm631_vm3, %v1465_v39, %v1467_v37  ;;  %v1469_v15 = vpop.permute.xlu1 %1468  ;;  %v1526_v1 = vrot.slane %v3204_v40, 4 }
 0x3a2   :  { %v1476_v43 = vsel %vm631_vm3, %v1467_v37, %v1469_v15  ;;  %1534 = vrot.lane.b32.xlu1 %v1525_v44, %s2665_s19  ;;  %v1486_v56 = vadd.f32 %v1475_v36, %v1276_v17  ;;  %v2006_v17 = vrot.slane %v2591_v6, 2 }
 0x3a3   :  { %v1487_v23 = vadd.f32 %v1476_v43, %v1277_v47  ;;  %1536 = vrot.lane.b32.xlu0 %v1526_v1, %s2665_s19 }
 0x3a4   :  { %v1471_v58 = vpop.permute.xlu0 %1470  ;;  %v1601_v19 = vmul.f32 %v1589_v48, %v1486_v56 }
 0x3a5   :  { %v1477_v35 = vsel %vm631_vm3, %v1469_v15, %v1471_v58  ;;  %v1473_v59 = vpop.permute.xlu1 %1472  ;;  %v1602_v39 = vmul.f32 %v1590_v51, %v1487_v23  ;;  %v2415_v23 = vld [vmem:[%s3370_s3 + $0x3] ss:$8 sm:$0xf] }
 0x3a6   :  { %v1478_v46 = vsel %vm631_vm3, %v1471_v58, %v1473_v59  ;;  %1538 = vrot.lane.b32.xlu1 %v1527_v55, %s2665_s19  ;;  %v1488_v61 = vadd.f32 %v1477_v35, %v1278_v60  ;;  %v1490_v34 = vadd.f32 %v1473_v59, %v1280_v10  ;;  %v2416_v51 = vld [vmem:[%s3370_s3 + $0x3] ss:$8 sm:$0x30] }
 0x3a7   :  { %v1489_v50 = vadd.f32 %v1478_v46, %v1279_v49  ;;  %1616 = vrot.lane.b32.xlu0 %v1602_v39, %s2666_s20  ;;  %v67_v58 = vor.u32 %v2416_v51, %v2415_v23 }
 0x3a8   :  { %v1586_v21 = vpop.permute.xlu0 %1585  ;;  %v1603_v24 = vmul.f32 %v1591_v52, %v1488_v61 }
 0x3a9   :  { %v1592_v42 = vsel %vm800_vm4, %v3167_v8, %v1586_v21  ;;  %v1588_v62 = vpop.permute.xlu1 %1587  ;;  %v1495_v59 = vrot.slane %v67_v58, %v2862_v7  ;;  %v1499_v39 = vrot.slane %v67_v58, %v2793_v25  ;;  %v51_v25 = vld [vmem:[%s3369_s2] sm:$0xff] }
 0x3aa   :  { %v1604_v22 = vmul.f32 %v1592_v42, %v1489_v50  ;;  %1614 = vrot.lane.b32.xlu1 %v1601_v19, %s2666_s20  ;;  %v1593_v63 = vsel %vm800_vm4, %v1586_v21, %v1588_v62  ;;  %v1503_v21 = vrot.slane %v67_v58, %v2804_v29 }
 0x3ab   :  { %v1605_v14 = vmul.f32 %v1593_v63, %v1490_v34  ;;  %v1512_v50 = vmul.f32 %v1495_v59, %v3175_v57  ;;  %v1513_v61 = vmul.f32 %v1499_v39, %v3189_v54  ;;  %v1507_v54 = vrot.slane %v67_v58, %v2810_v31 }
 0x3ac   :  { %1620 = vrot.lane.b32.xlu0 %v1604_v22, %s2666_s20  ;;  %v1514_v57 = vmul.f32 %v1503_v21, %v3199_v13  ;;  %v1651_v34 = vcombine.high %v51_v25, %v51_v25 }
 0x3ae   :  { %1618 = vrot.lane.b32.xlu1 %v1603_v24, %s2666_s20 }
 0x3b0   :  { %2203 = vperm.xlu0 %2533, %v75_v45  }
 0x3b2   :  { %1622 = vrot.lane.b32.xlu1 %v1605_v14, %s2666_s20 }
 0x3b6   :  { %2220 = vperm.xlu1 %2534, %v76_v32  }
 0x3b9   :  { %v1744_v26 = vpop.permute.xlu0 %1743 }
 0x3ba   :  { %v1639_v43 = vpop.permute.xlu1 %1638 }
 0x3e8   :  { %v1940_v8 = vpop.f32.mrb[36].mxu1  ;;  %v1981_v33 = vpop.f32.mrb[40].mxu0 }
 0x3e9   :  { %v1941_v12 = vadd.f32 %v1940_v8, %v1744_v26  ;;  %v1982_v28 = vadd.f32 %v1981_v33, %v1744_v26  ;;  %v1942_v27 = vpop.f32.mrb[37].mxu1  ;;  %v1983_v53 = vpop.f32.mrb[41].mxu0 }
 0x3ea   :  { %v1943_v0 = vadd.f32 %v1942_v27, %v1744_v26  ;;  %v1984_v16 = vadd.f32 %v1983_v53, %v1744_v26  ;;  %v1944_v2 = vpop.f32.mrb[38].mxu1  ;;  %v1985_v38 = vpop.f32.mrb[42].mxu0 }
 0x3eb   :  { %v3248_v41 = vmax.f32 %v1941_v12, 0.0  ;;  %v3250_v9 = vmax.f32 %v1982_v28, 0.0  ;;  %v1945_v11 = vpop.f32.mrb[39].mxu1  ;;  %v1986_v20 = vpop.f32.mrb[43].mxu0  ;;  %v1515_v28 = vmul.f32 %v1507_v54, %v3204_v40 }
 0x3ec   :  { %v3252_v30 = vmax.f32 %v1943_v0, 0.0  ;;  %v3254_v4 = vmax.f32 %v1984_v16, 0.0  ;;  %v52_v11 = vld [vmem:[%s3369_s2 + $0x8] sm:$0xff] }
 0x3ed   :  { %v1999_v37 = vpack.c.bf16 %v3248_v41, %v3248_v41  ;;  %v2001_v44 = vpack.c.bf16 %v3250_v9, %v3250_v9 }
 0x3ee   :  { %v2000_v47 = vpack.c.bf16 %v3252_v30, %v3252_v30  ;;  %v2002_v36 = vpack.c.bf16 %v3254_v4, %v3254_v4 }
 0x3ef   :  { %v2011_v15 = vsel %vm115_vm0, %v1999_v37, 0  ;;  %v2017_v1 = vsel %vm115_vm0, %v2001_v44, 0 }
 0x3f0   :  { %2496 = vmatprep.subr.msk.bf16.mxu1 %vm115_vm0, %v2000_v47  ;;  %2498 = vmatprep.subr.msk.bf16.mxu0 %vm115_vm0, %v2002_v36  ;;  %v1652_v36 = vcombine.high %v52_v11, %v52_v11 }
 0x3f1   :  { %2023 = vmatpush1.bf16.msra.mxu1 %v2011_v15  ;;  %2064 = vmatpush1.bf16.msra.mxu0 %v2017_v1 }
 0x3f4   :  { %2497 = vmatmul.mubr.msk.bf16.vlgmr.msra.gmra.mrb[40].mxu1 %vm111_vm1, %v2006_v17  ;;  %2499 = vmatmul.mubr.msk.bf16.vlgmr.msra.gmra.mrb[44].mxu0 %vm111_vm1, %v2006_v17  ;;  %v1992_v17 = vld [vmem:[%s3372_s5] sm:$0x3] }
 0x3f5   :  { %2151 = vmatprep.mubr.bf16.mxu1 %v2661_v3  ;;  %2192 = vmatprep.mubr.bf16.mxu0 %v2661_v3 }
 0x409   :  { %v1529_v5 = vpop.permute.xlu0 %1528 }
 0x40d   :  { %v1613_v18 = vpop.permute.xlu0 %1612 }
 0x410   :  { %v1531_v55 = vpop.permute.xlu1 %1530 }
 0x411   :  { %v1533_v56 = vpop.permute.xlu0 %1532  ;;  %v1540_v46 = vsel %vm745_vm5, %v1529_v5, %v1531_v55 }
 0x412   :  { %v1541_v48 = vsel %vm745_vm5, %v1531_v55, %v1533_v56  ;;  %v1548_v42 = vadd.f32 %v1540_v46, %v1512_v50 }
 0x413   :  { %v1549_v22 = vadd.f32 %v1541_v48, %v1513_v61 }
 0x414   :  { %v1535_v49 = vpop.permute.xlu1 %1534 }
 0x415   :  { %v1537_v35 = vpop.permute.xlu0 %1536 }
 0x416   :  { %v1542_v52 = vsel %vm745_vm5, %v1535_v49, %v1537_v35 }
 0x417   :  { %v1550_v45 = vadd.f32 %v1542_v52, %v1514_v57 }
 0x418   :  { %v1539_v60 = vpop.permute.xlu1 %1538 }
 0x419   :  { %v1617_v19 = vpop.permute.xlu0 %1616  ;;  %v1543_v33 = vsel %vm745_vm5, %v1537_v35, %v1539_v60 }
 0x41a   :  { %v1551_v13 = vadd.f32 %v1543_v33, %v1515_v28 }
 0x41c   :  { %v1615_v62 = vpop.permute.xlu1 %1614 }
 0x41d   :  { %v1624_v10 = vsel %vm836_vm6, %v1613_v18, %v1615_v62  ;;  %v1625_v24 = vsel %vm836_vm6, %v1615_v62, %v1617_v19 }
 0x41e   :  { %v1632_v63 = vadd.f32 %v1624_v10, %v1548_v42  ;;  %v1633_v29 = vadd.f32 %v1625_v24, %v1549_v22  ;;  %v1621_v26 = vpop.permute.xlu0 %1620 }
 0x420   :  { %v1641_v14 = vadd.f32 %v1639_v43, %v1632_v63  ;;  %v1642_v32 = vadd.f32 %v1639_v43, %v1633_v29  ;;  %v1619_v8 = vpop.permute.xlu1 %1618 }
 0x421   :  { %v1626_v12 = vsel %vm836_vm6, %v1619_v8, %v1621_v26 }
 0x422   :  { %v1645_v27 = vmax.f32 %v1641_v14, 0.0  ;;  %v1646_v53 = vmax.f32 %v1642_v32, 0.0  ;;  %v1634_v0 = vadd.f32 %v1626_v12, %v1550_v45  ;;  %v1994_v32 = vld [vmem:[%s3372_s5 + $0x4] sm:$0x1]  ;;  %s2669_s5 = smov [#allocation5]  }
 0x423   :  { %s2402_s13 = sshll.u32 %s2669_s5, 4  ;;  %s2403_s13 = int_to_ptr.vmem [resolvable:$true] %s2402_s13 }
 0x424   :  { %v3299_v16 = vadd.f32 %v1645_v27, %v51_v25  ;;  %v3301_v31 = vadd.f32 %v1651_v34, %v1646_v53  ;;  %v1643_v2 = vadd.f32 %v1639_v43, %v1634_v0  ;;  %v1623_v38 = vpop.permute.xlu1 %1622  ;;  %s2631_s17 = scalar_lea.vmem %s2403_s13, 512  ;;  %p2636_p9 = scmp.lt.s32.totalorder %s2403_s13, %s2403_s13 }
 0x425   :  { %v1627_v20 = vsel %vm836_vm6, %v1621_v26, %v1623_v38  ;;  %p2632_p8 = scmp.ne.s32.totalorder %s2403_s13, %s2631_s17  ;;  %p2637_p10 = scmp.lt.s32.totalorder %s2631_s17, %s2631_s17 }
 0x426   :  { %v1647_v6 = vmax.f32 %v1643_v2, 0.0  ;;  %v1635_v37 = vadd.f32 %v1627_v20, %v1551_v13  ;;  %v1996_v40 = vpack.c.bf16 %v3301_v31, %v3301_v31  ;;  %v1995_v44 = vpack.c.bf16 %v3299_v16, %v3299_v16 }
 0x427   :  { %p2638_p11 = por %p2637_p10, %p2636_p9 }
 0x428   :  { %v3311_v47 = vadd.f32 %v1647_v6, %v52_v11  ;;  %v1644_v15 = vadd.f32 %v1639_v43, %v1635_v37  ;;  %2500 = vmatprep.subr.msk.bf16.mxu1 %vm115_vm0, %v1996_v40  ;;  %v2108_v1 = vsel %vm115_vm0, %v1995_v44, 0 }
 0x429   :  { %2120 = vmatpush1.bf16.msra.mxu1 %v2108_v1  ;;  %p2639_p12 = pnand %p2638_p11, %p2632_p8 }
 0x42a   :  { %v1648_v5 = vmax.f32 %v1644_v15, 0.0  ;;  %v1997_v23 = vpack.c.bf16 %v3311_v47, %v3311_v47 }
 0x42c   :  { %v3318_v18 = vadd.f32 %v1652_v36, %v1648_v5  ;;  %2501 = vmatmul.mubr.msk.bf16.vlgmr.msra.gmra.mrb[44].mxu1 %vm111_vm1, %v1992_v17  ;;  %v2114_v51 = vsel %vm115_vm0, %v1997_v23, 0 }
 0x42d   :  { %2270 = vmatprep.mubr.bf16.mxu1 %v2661_v3 }
 0x42e   :  { %v1998_v43 = vpack.c.bf16 %v3318_v18, %v3318_v18 }
 0x42f   :  { %v2204_v61 = vpop.permute.xlu0 %2203 }
 0x430   :  { %2502 = vmatprep.subr.msk.bf16.mxu0 %vm115_vm0, %v1998_v43 }
 0x431   :  { %2161 = vmatpush1.bf16.msra.mxu0 %v2114_v51 }
 0x434   :  { %2503 = vmatmul.mubr.msk.bf16.vlgmr.msra.gmra.mrb[48].mxu0 %vm111_vm1, %v1992_v17 }
 0x435   :  { %2311 = vmatprep.mubr.bf16.mxu0 %v2661_v3  ;;  %v2221_v53 = vpop.permute.xlu1 %2220 }
 0x4c7   :  { %v2056_v55 = vpop.f32.mrb[40].mxu1  ;;  %v2097_v56 = vpop.f32.mrb[44].mxu0 }
 0x4c8   :  { %v2058_v58 = vpop.f32.mrb[41].mxu1  ;;  %v2099_v49 = vpop.f32.mrb[45].mxu0 }
 0x4c9   :  { %v2060_v35 = vpop.f32.mrb[42].mxu1  ;;  %v2101_v59 = vpop.f32.mrb[46].mxu0 }
 0x4ca   :  { %v2061_v39 = vpop.f32.mrb[43].mxu1  ;;  %v2102_v60 = vpop.f32.mrb[47].mxu0 }
 0x4ff   :  { %v2153_v46 = vpop.f32.mrb[44].mxu1 }
 0x500   :  { %v2154_v48 = vadd.f32 %v2153_v46, %v2056_v55  ;;  %v2155_v50 = vpop.f32.mrb[45].mxu1 }
 0x501   :  { %v2156_v21 = vadd.f32 %v2155_v50, %v2058_v58  ;;  %v2157_v19 = vpop.f32.mrb[46].mxu1 }
 0x502   :  { %v2206_v42 = vadd.f32 %v2204_v61, %v2154_v48  ;;  %v2158_v22 = vpop.f32.mrb[47].mxu1 }
 0x503   :  { %v2207_v62 = vadd.f32 %v2204_v61, %v2156_v21 }
 0x504   :  { %v2210_v52 = vmax.f32 %v2206_v42, 0.0 }
 0x505   :  { %v2211_v25 = vmax.f32 %v2207_v62, 0.0 }
 0x506   :  { %v2214_v3 = vpack.c.bf16 %v2210_v52, %v2210_v52 }
 0x507   :  { %v2215_v10 = vpack.c.bf16 %v2211_v25, %v2211_v25  ;;  %v2194_v24 = vpop.f32.mrb[48].mxu0 }
 0x508   :  { %v2195_v57 = vadd.f32 %v2194_v24, %v2097_v56  ;;  %v2196_v54 = vpop.f32.mrb[49].mxu0  ;;  %v2227_v63 = vsel %vm115_vm0, %v2214_v3, 0 }
 0x509   :  { %v2197_v29 = vadd.f32 %v2196_v54, %v2099_v49  ;;  %v2198_v45 = vpop.f32.mrb[50].mxu0  ;;  %2504 = vmatprep.subr.msk.bf16.mxu1 %vm115_vm0, %v2215_v10 }
 0x50a   :  { %v2208_v34 = vadd.f32 %v2204_v61, %v2195_v57  ;;  %v2199_v14 = vpop.f32.mrb[51].mxu0  ;;  %2239 = vmatpush1.bf16.msra.mxu1 %v2227_v63 }
 0x50b   :  { %v2209_v26 = vadd.f32 %v2204_v61, %v2197_v29 }
 0x50c   :  { %v2212_v8 = vmax.f32 %v2208_v34, 0.0 }
 0x50d   :  { %v2213_v33 = vmax.f32 %v2209_v26, 0.0  ;;  %2505 = vmatmul.mubr.msk.bf16.vlgmr.msra.gmra.mrb[48].mxu1 %vm111_vm1, %v1994_v32 }
 0x50e   :  { %v2216_v12 = vpack.c.bf16 %v2212_v8, %v2212_v8 }
 0x50f   :  { %v2217_v28 = vpack.c.bf16 %v2213_v33, %v2213_v33 }
 0x510   :  { %v2233_v27 = vsel %vm115_vm0, %v2216_v12, 0 }
 0x511   :  { %2506 = vmatprep.subr.msk.bf16.mxu0 %vm115_vm0, %v2217_v28 }
 0x512   :  { %2280 = vmatpush1.bf16.msra.mxu0 %v2233_v27 }
 0x515   :  { %2507 = vmatmul.mubr.msk.bf16.vlgmr.msra.gmra.mrb[52].mxu0 %vm111_vm1, %v1994_v32 }
 0x5e0   :  { %v2272_v0 = vpop.f32.mrb[48].mxu1 }
 0x5e1   :  { %v2273_v13 = vadd.f32 %v2272_v0, %v2221_v53  ;;  %v2274_v2 = vpop.f32.mrb[49].mxu1 }
 0x5e2   :  { %v2275_v38 = vadd.f32 %v2274_v2, %v2221_v53  ;;  %v2276_v11 = vpop.f32.mrb[50].mxu1 }
 0x5e3   :  { %v2320_v20 = vmax.f32 %v2273_v13, 0.0  ;;  %v2277_v6 = vpop.f32.mrb[51].mxu1 }
 0x5e4   :  { %v2321_v37 = vmax.f32 %v2275_v38, 0.0 }
 0x5e5   :  { %v2508_v40 = vmul.f32 -1.442695, %v2320_v20 }
 0x5e6   :  { %v2509_v44 = vmul.f32 -1.442695, %v2321_v37 }
 0x5e7   :  { %2593 = vpow2.f32 %v2508_v40 }
 0x5e8   :  { %2595 = vpow2.f32 %v2509_v44  ;;  %v2313_v36 = vpop.f32.mrb[52].mxu0 }
 0x5e9   :  { %v2314_v15 = vadd.f32 %v2313_v36, %v2221_v53  ;;  %v2315_v1 = vpop.f32.mrb[53].mxu0 }
 0x5ea   :  { %v2316_v17 = vadd.f32 %v2315_v1, %v2221_v53  ;;  %v2317_v5 = vpop.f32.mrb[54].mxu0 }
 0x5eb   :  { %v2322_v23 = vmax.f32 %v2314_v15, 0.0  ;;  %v2318_v43 = vpop.f32.mrb[55].mxu0 }
 0x5ec   :  { %v2323_v51 = vmax.f32 %v2316_v17, 0.0 }
 0x5ed   :  { %v2510_v55 = vmul.f32 -1.442695, %v2322_v23 }
 0x5ee   :  { %v2511_v56 = vmul.f32 -1.442695, %v2323_v51 }
 0x5ef   :  { %2597 = vpow2.f32 %v2510_v55 }
 0x5f0   :  { %2599 = vpow2.f32 %v2511_v56 }
 0x5f1   :  { %v2594_v58 = vpop.eup %2593 }
 0x5f2   :  { %v2596_v49 = vpop.eup %2595  ;;  %v2336_v35 = vadd.f32 1.0, %v2594_v58 }
 0x5f3   :  { %v2337_v59 = vadd.f32 1.0, %v2596_v49 }
 0x5f4   :  { %2601 = vrcp.f32 %v2336_v35 }
 0x5f5   :  { %2603 = vrcp.f32 %v2337_v59 }
 0x5f9   :  { %v2598_v39 = vpop.eup %2597 }
 0x5fa   :  { %v2600_v60 = vpop.eup %2599  ;;  %v2338_v46 = vadd.f32 1.0, %v2598_v39 }
 0x5fb   :  { %v2339_v48 = vadd.f32 1.0, %v2600_v60 }
 0x5fc   :  { %2605 = vrcp.f32 %v2338_v46 }
 0x5fd   :  { %2607 = vrcp.f32 %v2339_v48 }
 0x5fe   :  { %v2602_v50 = vpop.eup %2601 }
 0x5ff   :  { %v2604_v61 = vpop.eup %2603  ;;  %v2348_v21 = vadd.f32 1.0, %v2602_v50 }
 0x600   :  { %v2349_v19 = vadd.f32 1.0, %v2604_v61 }
 0x601   :  { %v2355_v42 = vrot.slane %v2348_v21, %v2862_v7 }
 0x602   :  { %v2359_v22 = vrot.slane %v2349_v19, %v2862_v7 }
 0x603   :  { %v2372_v62 = vmul.f32 %v2355_v42, %v3248_v41  ;;  %v2368_v25 = vmul.f32 %v2355_v42, %v3299_v16 }
 0x604   :  { %v2373_v52 = vmul.f32 %v2359_v22, %v3252_v30  ;;  %v2369_v24 = vmul.f32 %v2359_v22, %v3301_v31 }
 0x605   :  { %v2380_v3 = vrot.slane %v2372_v62, 4 }
 0x606   :  { %v2606_v10 = vpop.eup %2605  ;;  %v2381_v57 = vrot.slane %v2373_v52, 4 }
 0x607   :  { %v2608_v54 = vpop.eup %2607  ;;  %v2350_v63 = vadd.f32 1.0, %v2606_v10  ;;  %v2388_v29 = vsel %vm1664_vm7, %v2368_v25, %v2380_v3 }
 0x608   :  { %v2351_v45 = vadd.f32 1.0, %v2608_v54  ;;  %v2389_v34 = vsel %vm1664_vm7, %v2369_v24, %v2381_v57  ;;  %2392 = vst [vmem:[#allocation5] sm:$0xff] %v2388_v29 }
 0x609   :  { %v2363_v14 = vrot.slane %v2350_v63, %v2862_v7  ;;  %2393 = vst [vmem:[#allocation5 + $0x8] sm:$0xff] %v2389_v34 }
 0x60a   :  { %v2367_v41 = vrot.slane %v2351_v45, %v2862_v7 }
 0x60b   :  { %v2374_v30 = vmul.f32 %v2363_v14, %v3250_v9  ;;  %v2370_v31 = vmul.f32 %v2363_v14, %v3311_v47 }
 0x60c   :  { %v2375_v16 = vmul.f32 %v2367_v41, %v3254_v4  ;;  %v2371_v26 = vmul.f32 %v2367_v41, %v3318_v18 }
 0x60d   :  { %v2382_v32 = vrot.slane %v2374_v30, 4 }
 0x60e   :  { %v2383_v8 = vrot.slane %v2375_v16, 4 }
 0x60f   :  { %v2390_v33 = vsel %vm1664_vm7, %v2370_v31, %v2382_v32 }
 0x610   :  { %v2391_v12 = vsel %vm1664_vm7, %v2371_v26, %v2383_v8  ;;  %2394 = vst [vmem:[#allocation5 + $0x10] sm:$0xff] %v2390_v33 }
 0x611   :  { %2395 = vst [vmem:[#allocation5 + $0x18] sm:$0xff] %v2391_v12 }
 0x612   :  { %2642 = shalt.err (!%p2639_p12)
}
 0x613   :  { %s2643_s22 = scalar_lea.hbm %s3376_s9, 512 }
 0x614   :  { %p2644_p13 = scmp.ne.s32.totalorder %s3376_s9, %s2643_s22  ;;  %p2647_p0 = scmp.lt.u32.totalorder %s2643_s22, %s3376_s9 }
 0x616   :  { %p2649_p1 = pnand %p2647_p0, %p2644_p13 }
 0x618   :  { %2652 = shalt.err (!%p2649_p1)
}
 0x619   :  { %2405 = dma.vmem_to_hbm [thread:$0]  %s2403_s13, 512, %s3376_s9, [#allocation4]  }
 0x61a   :  { %2655 = dma.done.wait [#allocation4], 512  }
 0x61b   :  { %2656 = vsyncadd [#allocation4], 4294966784 }
 0x61c   :  { %2409 = vsyncpa [#allocation3], 1 }
 0x61d   :  { %2410 = vsyncpa [#allocation4], 1 }

</bundles_post_ra>
